<compile_context>
chip_gen: v6e
topology: v6e:2x2x1
jax: 0.10.0
libtpu: 0.0.40
codegen_flags: <defaults>
</compile_context>

<pallas_src>
import functools

import numpy as np
import jax
import jax.numpy as jnp
from jax.experimental import pallas as pl
from jax.experimental.pallas import tpu as pltpu


# --------------------------------------------------------------------------
# Fused kernel: semseg post-proc + temporal interpolation + bandwidth exp
# --------------------------------------------------------------------------
def _fused_kernel(inv_ref, logits_ref, bw_ref, fg_ref, mc_ref, bwo_ref, *, tr):
    """One H-tile (Ht rows) of the fused pipeline.

        inv_ref    : (T,)             SMEM  per-frame 1/count
        logits_ref : (T, C, Ht, W)    accumulated semseg logits (native layout)
        bw_ref     : (V, T, Ht, W)    raw bandwidth logits (V-channel window)
        fg_ref     : (T, Ht, W)       thresholded fg masks                 (out)
        mc_ref     : (T, C-1, Ht, W)  multiclass softmax probs             (out)
        bwo_ref    : (V, T, Ht, W)    exp(bandwidths) * 10                 (out)
    """
    t = logits_ref.shape[0]
    c = logits_ref.shape[1]

    # --- per frame: scale by 1/count, channel softmax, foreground sigmoid ------------
    fg_rows = []
    for i in range(t):
        scale = inv_ref[i]                                             # SMEM scalar
        mc_logits = logits_ref[i, 0:c - 1, :, :].astype(jnp.float32) * scale
        m = jnp.max(mc_logits, axis=0, keepdims=True)                  # reduce over C-1
        e = jnp.exp(mc_logits - m)
        mc_ref[i] = (e / jnp.sum(e, axis=0, keepdims=True)).astype(mc_ref.dtype)

        fg_logit = logits_ref[i, c - 1, :, :].astype(jnp.float32) * scale
        fg_rows.append(1.0 / (1.0 + jnp.exp(-fg_logit)))               # exact sigmoid

    # --- interpol_func_1: unrolled fwd/bwd 2nd-order recurrence on full (Ht,W) slabs -
    def _interp(a, b, cur):
        return 0.2 * a + 0.3 * b + 0.5 * cur

    fwd = list(fg_rows)
    for i in range(2, t):
        fwd[i] = _interp(fwd[i - 2], fwd[i - 1], fg_rows[i])
    bwd = list(fg_rows)
    for i in range(t - 3, -1, -1):
        bwd[i] = _interp(bwd[i + 2], bwd[i + 1], fg_rows[i])
    for i in range(t):
        avg = (fwd[i] + bwd[i]) * 0.5
        fg_ref[i] = jnp.where(avg < tr, 0.0, 1.0).astype(fg_ref.dtype)  # full-slab store

    # --- bandwidths: exp() * 10 -------------------------------------------------------
    bwo_ref[...] = (jnp.exp(bw_ref[...].astype(jnp.float32)) * 10.0).astype(bwo_ref.dtype)


def _pick_h_tile(h, w, t, c, v, mc_bytes, budget_bytes=20 << 20):
    """Rows of H per grid step: a multiple of 8, sized against ~20 MiB of VMEM
    (double-buffered I/O + recurrence temporaries; safe on v7x's 32 MiB scoped default),
    and guaranteeing >= 2 grid steps when H > 8 so v7x's two TensorCores both work."""
    per_row = ((t * c * 4) + (v * t * 4)                                   # inputs (f32)
               + (t * 4) + (t * (c - 1) * mc_bytes) + (v * t * 4)) * w * 2  # outs, 2-buf
    per_row += 3 * t * 4 * w                                               # fwd/bwd/avg tmp
    if h <= 8:
        return h
    h8 = -(-h // 8) * 8
    max_rows = max(8, (budget_bytes // max(per_row, 1)) // 8 * 8)
    ht = min(max_rows, h8)
    if ht >= h:            # would collapse to a single grid step -> split in two
        ht = max(8, -(-((h + 1) // 2) // 8) * 8)
    return ht


def _fused_pallas_call(inv_counts, semseg_logits, emb_operand, bw_chan_block,
                       *, v_ch, tr, mc_dtype, ht):
    t, c, h, w = semseg_logits.shape
    grid = (pl.cdiv(h, ht),)

    return pl.pallas_call(
        functools.partial(_fused_kernel, tr=tr),
        out_shape=(
            jax.ShapeDtypeStruct((t, h, w), jnp.float32),          # thresholded fg masks
            jax.ShapeDtypeStruct((t, c - 1, h, w), mc_dtype),      # multiclass probs
            jax.ShapeDtypeStruct((v_ch, t, h, w), jnp.float32),    # exp(bw) * 10
        ),
        grid_spec=pltpu.PrefetchScalarGridSpec(
            num_scalar_prefetch=0,
            grid=grid,
            in_specs=[
                # (T,) per-frame 1/count -> SMEM scalar table, never re-DMA'd
                pl.BlockSpec(memory_space=pltpu.MemorySpace.SMEM),
                # native (T, C, H, W) layout, H tiled
                pl.BlockSpec((t, c, ht, w), lambda s: (0, 0, s, 0)),
                # V bandwidth channels selected out of the full embedding-head output
                pl.BlockSpec((v_ch, t, ht, w),
                             lambda s, _b=bw_chan_block: (_b, 0, s, 0)),
            ],
            out_specs=(
                pl.BlockSpec((t, ht, w), lambda s: (0, s, 0)),
                pl.BlockSpec((t, c - 1, ht, w), lambda s: (0, 0, s, 0)),
                pl.BlockSpec((v_ch, t, ht, w), lambda s: (0, 0, s, 0)),
            ),
        ),
        compiler_params=pltpu.CompilerParams(
            # independent H tiles -> megacore sharding on v7x
            dimension_semantics=("parallel",),
            vmem_limit_bytes=32 << 20,
        ),
    )(inv_counts, semseg_logits, emb_operand)


# --------------------------------------------------------------------------
# Forward (numeric portion) — native layouts, single fused kernel
# --------------------------------------------------------------------------
@functools.partial(jax.jit, static_argnames=("embedding_size", "variance_channels",
                                             "seediness_channels", "tr", "mc_dtype"))
def fused_inference_forward(semseg_logits, counts, embedding_head_output, *,
                            embedding_size, variance_channels, seediness_channels,
                            tr=0.12, mc_dtype=jnp.bfloat16):
    t, c, h, w = semseg_logits.shape
    e_ch, v_ch, s_ch = embedding_size, variance_channels, seediness_channels

    # NOTE: count==0 frames are guarded with max(count, 1); the torch reference would
    # divide by zero for such frames.
    inv_counts = (1.0 / jnp.maximum(counts, 1).astype(jnp.float32)).reshape(t)

    if e_ch % v_ch == 0:
        # Select the V bandwidth channels straight out of the full embedding-head output
        # via the BlockSpec index_map (block index e_ch // v_ch): no HBM slice copy.
        emb_operand, bw_chan_block = embedding_head_output, e_ch // v_ch
    else:
        # TODO(synk): channel offset not a multiple of V -> fall back to a slice copy.
        emb_operand = jax.lax.dynamic_slice_in_dim(embedding_head_output, e_ch, v_ch, 0)
        bw_chan_block = 0

    mc_bytes = np.dtype(mc_dtype).itemsize
    ht = _pick_h_tile(h, w, t, c, v_ch, mc_bytes)

    fg_masks, multiclass_masks, subseq_bandwidths = _fused_pallas_call(
        inv_counts, semseg_logits, emb_operand, bw_chan_block,
        v_ch=v_ch, tr=tr, mc_dtype=mc_dtype, ht=ht)

    subseq_embeddings = embedding_head_output[:e_ch]
    subseq_seediness = embedding_head_output[e_ch + v_ch:e_ch + v_ch + s_ch]
    return (fg_masks, multiclass_masks, subseq_embeddings,
            subseq_bandwidths, subseq_seediness)


class InferenceModelPallas:
    # channel split of the embedding head output (embedding / variance / seediness)
    EMBEDDING_SIZE = 4
    VARIANCE_CHANNELS = 2
    SEEDINESS_CHANNELS = 1

    def __init__(self, semseg_output_type="probs"):
        # TODO(synk): only the 'probs' output type and the C>2 (multiclass+fg) branch
        # are implemented; 'logits'/'argmax' and the 2-channel branch are omitted.
        assert semseg_output_type == "probs"
        self.semseg_output_type = semseg_output_type

    def forward(self, semseg_logits, counts, embedding_head_output):
        fg, mc, emb, bw, seed = fused_inference_forward(
            semseg_logits, counts, embedding_head_output,
            embedding_size=self.EMBEDDING_SIZE,
            variance_channels=self.VARIANCE_CHANNELS,
            seediness_channels=self.SEEDINESS_CHANNELS,
            tr=0.12)
        return {
            "fg_masks": fg,
            "multiclass_masks": mc,
            "embeddings": {
                "embeddings": emb,
                "bandwidths": bw,
                "seediness": seed,
            },
        }


# --------------------------------------------------------------------------
# Reference (pure numpy) for verification
# --------------------------------------------------------------------------
def _ref_forward(semseg_logits, counts, emb_out, E, V):
    logits = np.asarray(semseg_logits, np.float32) / np.asarray(counts, np.float32)[:, None, None, None]
    mc_logits = logits[:, :-1]
    fg_logits = logits[:, -1]
    m = mc_logits.max(axis=1, keepdims=True)
    e = np.exp(mc_logits - m)
    mc = e / e.sum(axis=1, keepdims=True)
    fg = 1.0 / (1.0 + np.exp(-fg_logits))

    def interp(a, b, c):
        return 0.2 * a + 0.3 * b + 0.5 * c

    T = fg.shape[0]
    fwd, bwd = {}, {}
    for i in range(T):
        fwd[i] = interp(fwd[i - 2], fwd[i - 1], fg[i]) if i >= 2 else fg[i]
    for i in reversed(range(T)):
        bwd[i] = interp(bwd[i + 2], bwd[i + 1], fg[i]) if i < T - 2 else fg[i]
    masks = []
    for i in range(T):
        mask = (bwd[i] + fwd[i]) / 2
        masks.append(np.where(mask < 0.12, 0.0, 1.0))
    fg_out = np.stack(masks).astype(np.float32)

    bw = np.exp(np.asarray(emb_out, np.float32)[E:E + V]) * 10.0
    return fg_out, mc, bw


if __name__ == "__main__":
    T, C, H, W = 8, 4, 16, 16          # 8 frames, 4 semseg channels (3 multiclass + fg)
    E, V, S = 4, 2, 1                  # embedding / variance / seediness channels

    key = jax.random.PRNGKey(0)
    k1, k2 = jax.random.split(key)
    # Accumulated semseg logits per frame and how many sub-sequences touched each frame.
    semseg_logits = jax.random.normal(k1, (T, C, H, W), dtype=jnp.float32)
    counts = jnp.array([1, 1, 2, 2, 2, 2, 1, 1], dtype=jnp.int32)
    # Synthetic embedding head output (E + V + S, T, H, W).
    embedding_head_output = jax.random.normal(k2, (E + V + S, T, H, W), dtype=jnp.float32)

    model = InferenceModelPallas()
    out = model.forward(semseg_logits, counts, embedding_head_output)
    out = jax.block_until_ready(out)

    # verify against pure-numpy reference
    fg_ref, mc_ref, bw_ref = _ref_forward(semseg_logits, counts, embedding_head_output, E, V)
    fg_got = np.asarray(out["fg_masks"])
    mc_got = np.asarray(out["multiclass_masks"], dtype=np.float32)   # bf16 -> f32
    bw_got = np.asarray(out["embeddings"]["bandwidths"])

    assert fg_got.shape == (T, H, W)
    assert mc_got.shape == (T, C - 1, H, W)
    assert bw_got.shape == (V, T, H, W)
    # thresholded masks: exact sigmoid in-kernel, allow a tiny fraction of boundary
    # flips from f32 associativity differences
    assert np.mean(fg_got != fg_ref) < 1e-3, "fg_masks mismatch"
    # multiclass probs are written back as bf16 (perf review) -> tolerance ~2^-9
    np.testing.assert_allclose(mc_got, mc_ref, atol=5e-3, rtol=0)
    np.testing.assert_allclose(bw_got, bw_ref, rtol=1e-5, atol=1e-4)

    print("KERNEL_OK")
</pallas_src>

<mosaic_0001>
module attributes {stable_mosaic.version = 11 : i64} {
  func.func @_fused_kernel(%arg0: i32, %arg1: memref<8xf32, #tpu.memory_space<smem>>, %arg2: memref<8x4x8x16xf32, #tpu.memory_space<vmem>>, %arg3: memref<2x8x8x16xf32, #tpu.memory_space<vmem>>, %arg4: memref<8x8x16xf32, #tpu.memory_space<vmem>>, %arg5: memref<8x3x8x16xbf16, #tpu.memory_space<vmem>>, %arg6: memref<2x8x8x16xf32, #tpu.memory_space<vmem>>) attributes {dimension_semantics = [#tpu.dimension_semantics<parallel>], iteration_bounds = array<i64: 2>, scalar_prefetch = 0 : i64, scratch_operands = 0 : i64, tpu.core_type = #tpu.core_type<tc>, window_params = [{transform_indices = @transform_0, window_bounds = array<i64: 8>}, {transform_indices = @transform_1, window_bounds = array<i64: 8, 4, 8, 16>}, {transform_indices = @transform_2, window_bounds = array<i64: 2, 8, 8, 16>}, {transform_indices = @transform_3, window_bounds = array<i64: 8, 8, 16>}, {transform_indices = @transform_4, window_bounds = array<i64: 8, 3, 8, 16>}, {transform_indices = @transform_5, window_bounds = array<i64: 2, 8, 8, 16>}]} {
    %c0 = arith.constant 0 : index
    %0 = memref.load %arg1[%c0] : memref<8xf32, #tpu.memory_space<smem>>
    %c0_0 = arith.constant 0 : index
    %c0_1 = arith.constant 0 : index
    %c0_2 = arith.constant 0 : index
    %c0_3 = arith.constant 0 : index
    %1 = vector.load %arg2[%c0_0, %c0_1, %c0_2, %c0_3] : memref<8x4x8x16xf32, #tpu.memory_space<vmem>>, vector<1x3x8x16xf32>
    %2 = vector.shape_cast %1 : vector<1x3x8x16xf32> to vector<3x8x16xf32>
    %3 = vector.broadcast %0 : f32 to vector<3x8x16xf32>
    %4 = arith.mulf %2, %3 : vector<3x8x16xf32>
    %cst = arith.constant dense<0xFF800000> : vector<8x16xf32>
    %5 = vector.multi_reduction <maximumf>, %4, %cst [0] : vector<3x8x16xf32> to vector<8x16xf32>
    %6 = vector.shape_cast %5 : vector<8x16xf32> to vector<1x8x16xf32>
    %7 = vector.broadcast %6 : vector<1x8x16xf32> to vector<3x8x16xf32>
    %8 = arith.subf %4, %7 : vector<3x8x16xf32>
    %9 = math.exp %8 : vector<3x8x16xf32>
    %cst_4 = arith.constant dense<0.000000e+00> : vector<8x16xf32>
    %10 = vector.multi_reduction <add>, %9, %cst_4 [0] : vector<3x8x16xf32> to vector<8x16xf32>
    %11 = vector.shape_cast %10 : vector<8x16xf32> to vector<1x8x16xf32>
    %12 = vector.broadcast %11 : vector<1x8x16xf32> to vector<3x8x16xf32>
    %13 = arith.divf %9, %12 : vector<3x8x16xf32>
    %14 = arith.truncf %13 : vector<3x8x16xf32> to vector<3x8x16xbf16>
    %c0_5 = arith.constant 0 : index
    %c0_6 = arith.constant 0 : index
    %c0_7 = arith.constant 0 : index
    %c0_8 = arith.constant 0 : index
    %15 = vector.load %arg5[%c0_5, %c0_6, %c0_7, %c0_8] : memref<8x3x8x16xbf16, #tpu.memory_space<vmem>>, vector<1x3x8x16xbf16>
    %16 = vector.shape_cast %15 : vector<1x3x8x16xbf16> to vector<3x8x16xbf16>
    %17 = vector.shape_cast %14 : vector<3x8x16xbf16> to vector<1x3x8x16xbf16>
    tpu.vector_store %arg5[%c0_5, %c0_6, %c0_7, %c0_8], %17 {strides = array<i32>} : memref<8x3x8x16xbf16, #tpu.memory_space<vmem>>, vector<1x3x8x16xbf16>,
    %c0_9 = arith.constant 0 : index
    %c3 = arith.constant 3 : index
    %c0_10 = arith.constant 0 : index
    %c0_11 = arith.constant 0 : index
    %18 = vector.load %arg2[%c0_9, %c3, %c0_10, %c0_11] : memref<8x4x8x16xf32, #tpu.memory_space<vmem>>, vector<1x1x8x16xf32>
    %19 = vector.shape_cast %18 : vector<1x1x8x16xf32> to vector<8x16xf32>
    %20 = vector.broadcast %0 : f32 to vector<8x16xf32>
    %21 = arith.mulf %19, %20 : vector<8x16xf32>
    %cst_12 = arith.constant 0.000000e+00 : f32
    %22 = vector.broadcast %cst_12 : f32 to vector<8x16xf32>
    %23 = arith.subf %22, %21 : vector<8x16xf32>
    %24 = math.exp %23 : vector<8x16xf32>
    %cst_13 = arith.constant 1.000000e+00 : f32
    %25 = vector.broadcast %cst_13 : f32 to vector<8x16xf32>
    %26 = arith.addf %25, %24 : vector<8x16xf32>
    %cst_14 = arith.constant 1.000000e+00 : f32
    %27 = vector.broadcast %cst_14 : f32 to vector<8x16xf32>
    %28 = arith.divf %27, %26 : vector<8x16xf32>
    %c1 = arith.constant 1 : index
    %29 = memref.load %arg1[%c1] : memref<8xf32, #tpu.memory_space<smem>>
    %c1_15 = arith.constant 1 : index
    %c0_16 = arith.constant 0 : index
    %c0_17 = arith.constant 0 : index
    %c0_18 = arith.constant 0 : index
    %30 = vector.load %arg2[%c1_15, %c0_16, %c0_17, %c0_18] : memref<8x4x8x16xf32, #tpu.memory_space<vmem>>, vector<1x3x8x16xf32>
    %31 = vector.shape_cast %30 : vector<1x3x8x16xf32> to vector<3x8x16xf32>
    %32 = vector.broadcast %29 : f32 to vector<3x8x16xf32>
    %33 = arith.mulf %31, %32 : vector<3x8x16xf32>
    %cst_19 = arith.constant dense<0xFF800000> : vector<8x16xf32>
    %34 = vector.multi_reduction <maximumf>, %33, %cst_19 [0] : vector<3x8x16xf32> to vector<8x16xf32>
    %35 = vector.shape_cast %34 : vector<8x16xf32> to vector<1x8x16xf32>
    %36 = vector.broadcast %35 : vector<1x8x16xf32> to vector<3x8x16xf32>
    %37 = arith.subf %33, %36 : vector<3x8x16xf32>
    %38 = math.exp %37 : vector<3x8x16xf32>
    %cst_20 = arith.constant dense<0.000000e+00> : vector<8x16xf32>
    %39 = vector.multi_reduction <add>, %38, %cst_20 [0] : vector<3x8x16xf32> to vector<8x16xf32>
    %40 = vector.shape_cast %39 : vector<8x16xf32> to vector<1x8x16xf32>
    %41 = vector.broadcast %40 : vector<1x8x16xf32> to vector<3x8x16xf32>
    %42 = arith.divf %38, %41 : vector<3x8x16xf32>
    %43 = arith.truncf %42 : vector<3x8x16xf32> to vector<3x8x16xbf16>
    %c1_21 = arith.constant 1 : index
    %c0_22 = arith.constant 0 : index
    %c0_23 = arith.constant 0 : index
    %c0_24 = arith.constant 0 : index
    %44 = vector.load %arg5[%c1_21, %c0_22, %c0_23, %c0_24] : memref<8x3x8x16xbf16, #tpu.memory_space<vmem>>, vector<1x3x8x16xbf16>
    %45 = vector.shape_cast %44 : vector<1x3x8x16xbf16> to vector<3x8x16xbf16>
    %46 = vector.shape_cast %43 : vector<3x8x16xbf16> to vector<1x3x8x16xbf16>
    tpu.vector_store %arg5[%c1_21, %c0_22, %c0_23, %c0_24], %46 {strides = array<i32>} : memref<8x3x8x16xbf16, #tpu.memory_space<vmem>>, vector<1x3x8x16xbf16>,
    %c1_25 = arith.constant 1 : index
    %c3_26 = arith.constant 3 : index
    %c0_27 = arith.constant 0 : index
    %c0_28 = arith.constant 0 : index
    %47 = vector.load %arg2[%c1_25, %c3_26, %c0_27, %c0_28] : memref<8x4x8x16xf32, #tpu.memory_space<vmem>>, vector<1x1x8x16xf32>
    %48 = vector.shape_cast %47 : vector<1x1x8x16xf32> to vector<8x16xf32>
    %49 = vector.broadcast %29 : f32 to vector<8x16xf32>
    %50 = arith.mulf %48, %49 : vector<8x16xf32>
    %cst_29 = arith.constant 0.000000e+00 : f32
    %51 = vector.broadcast %cst_29 : f32 to vector<8x16xf32>
    %52 = arith.subf %51, %50 : vector<8x16xf32>
    %53 = math.exp %52 : vector<8x16xf32>
    %cst_30 = arith.constant 1.000000e+00 : f32
    %54 = vector.broadcast %cst_30 : f32 to vector<8x16xf32>
    %55 = arith.addf %54, %53 : vector<8x16xf32>
    %cst_31 = arith.constant 1.000000e+00 : f32
    %56 = vector.broadcast %cst_31 : f32 to vector<8x16xf32>
    %57 = arith.divf %56, %55 : vector<8x16xf32>
    %c2 = arith.constant 2 : index
    %58 = memref.load %arg1[%c2] : memref<8xf32, #tpu.memory_space<smem>>
    %c2_32 = arith.constant 2 : index
    %c0_33 = arith.constant 0 : index
    %c0_34 = arith.constant 0 : index
    %c0_35 = arith.constant 0 : index
    %59 = vector.load %arg2[%c2_32, %c0_33, %c0_34, %c0_35] : memref<8x4x8x16xf32, #tpu.memory_space<vmem>>, vector<1x3x8x16xf32>
    %60 = vector.shape_cast %59 : vector<1x3x8x16xf32> to vector<3x8x16xf32>
    %61 = vector.broadcast %58 : f32 to vector<3x8x16xf32>
    %62 = arith.mulf %60, %61 : vector<3x8x16xf32>
    %cst_36 = arith.constant dense<0xFF800000> : vector<8x16xf32>
    %63 = vector.multi_reduction <maximumf>, %62, %cst_36 [0] : vector<3x8x16xf32> to vector<8x16xf32>
    %64 = vector.shape_cast %63 : vector<8x16xf32> to vector<1x8x16xf32>
    %65 = vector.broadcast %64 : vector<1x8x16xf32> to vector<3x8x16xf32>
    %66 = arith.subf %62, %65 : vector<3x8x16xf32>
    %67 = math.exp %66 : vector<3x8x16xf32>
    %cst_37 = arith.constant dense<0.000000e+00> : vector<8x16xf32>
    %68 = vector.multi_reduction <add>, %67, %cst_37 [0] : vector<3x8x16xf32> to vector<8x16xf32>
    %69 = vector.shape_cast %68 : vector<8x16xf32> to vector<1x8x16xf32>
    %70 = vector.broadcast %69 : vector<1x8x16xf32> to vector<3x8x16xf32>
    %71 = arith.divf %67, %70 : vector<3x8x16xf32>
    %72 = arith.truncf %71 : vector<3x8x16xf32> to vector<3x8x16xbf16>
    %c2_38 = arith.constant 2 : index
    %c0_39 = arith.constant 0 : index
    %c0_40 = arith.constant 0 : index
    %c0_41 = arith.constant 0 : index
    %73 = vector.load %arg5[%c2_38, %c0_39, %c0_40, %c0_41] : memref<8x3x8x16xbf16, #tpu.memory_space<vmem>>, vector<1x3x8x16xbf16>
    %74 = vector.shape_cast %73 : vector<1x3x8x16xbf16> to vector<3x8x16xbf16>
    %75 = vector.shape_cast %72 : vector<3x8x16xbf16> to vector<1x3x8x16xbf16>
    tpu.vector_store %arg5[%c2_38, %c0_39, %c0_40, %c0_41], %75 {strides = array<i32>} : memref<8x3x8x16xbf16, #tpu.memory_space<vmem>>, vector<1x3x8x16xbf16>,
    %c2_42 = arith.constant 2 : index
    %c3_43 = arith.constant 3 : index
    %c0_44 = arith.constant 0 : index
    %c0_45 = arith.constant 0 : index
    %76 = vector.load %arg2[%c2_42, %c3_43, %c0_44, %c0_45] : memref<8x4x8x16xf32, #tpu.memory_space<vmem>>, vector<1x1x8x16xf32>
    %77 = vector.shape_cast %76 : vector<1x1x8x16xf32> to vector<8x16xf32>
    %78 = vector.broadcast %58 : f32 to vector<8x16xf32>
    %79 = arith.mulf %77, %78 : vector<8x16xf32>
    %cst_46 = arith.constant 0.000000e+00 : f32
    %80 = vector.broadcast %cst_46 : f32 to vector<8x16xf32>
    %81 = arith.subf %80, %79 : vector<8x16xf32>
    %82 = math.exp %81 : vector<8x16xf32>
    %cst_47 = arith.constant 1.000000e+00 : f32
    %83 = vector.broadcast %cst_47 : f32 to vector<8x16xf32>
    %84 = arith.addf %83, %82 : vector<8x16xf32>
    %cst_48 = arith.constant 1.000000e+00 : f32
    %85 = vector.broadcast %cst_48 : f32 to vector<8x16xf32>
    %86 = arith.divf %85, %84 : vector<8x16xf32>
    %c3_49 = arith.constant 3 : index
    %87 = memref.load %arg1[%c3_49] : memref<8xf32, #tpu.memory_space<smem>>
    %c3_50 = arith.constant 3 : index
    %c0_51 = arith.constant 0 : index
    %c0_52 = arith.constant 0 : index
    %c0_53 = arith.constant 0 : index
    %88 = vector.load %arg2[%c3_50, %c0_51, %c0_52, %c0_53] : memref<8x4x8x16xf32, #tpu.memory_space<vmem>>, vector<1x3x8x16xf32>
    %89 = vector.shape_cast %88 : vector<1x3x8x16xf32> to vector<3x8x16xf32>
    %90 = vector.broadcast %87 : f32 to vector<3x8x16xf32>
    %91 = arith.mulf %89, %90 : vector<3x8x16xf32>
    %cst_54 = arith.constant dense<0xFF800000> : vector<8x16xf32>
    %92 = vector.multi_reduction <maximumf>, %91, %cst_54 [0] : vector<3x8x16xf32> to vector<8x16xf32>
    %93 = vector.shape_cast %92 : vector<8x16xf32> to vector<1x8x16xf32>
    %94 = vector.broadcast %93 : vector<1x8x16xf32> to vector<3x8x16xf32>
    %95 = arith.subf %91, %94 : vector<3x8x16xf32>
    %96 = math.exp %95 : vector<3x8x16xf32>
    %cst_55 = arith.constant dense<0.000000e+00> : vector<8x16xf32>
    %97 = vector.multi_reduction <add>, %96, %cst_55 [0] : vector<3x8x16xf32> to vector<8x16xf32>
    %98 = vector.shape_cast %97 : vector<8x16xf32> to vector<1x8x16xf32>
    %99 = vector.broadcast %98 : vector<1x8x16xf32> to vector<3x8x16xf32>
    %100 = arith.divf %96, %99 : vector<3x8x16xf32>
    %101 = arith.truncf %100 : vector<3x8x16xf32> to vector<3x8x16xbf16>
    %c3_56 = arith.constant 3 : index
    %c0_57 = arith.constant 0 : index
    %c0_58 = arith.constant 0 : index
    %c0_59 = arith.constant 0 : index
    %102 = vector.load %arg5[%c3_56, %c0_57, %c0_58, %c0_59] : memref<8x3x8x16xbf16, #tpu.memory_space<vmem>>, vector<1x3x8x16xbf16>
    %103 = vector.shape_cast %102 : vector<1x3x8x16xbf16> to vector<3x8x16xbf16>
    %104 = vector.shape_cast %101 : vector<3x8x16xbf16> to vector<1x3x8x16xbf16>
    tpu.vector_store %arg5[%c3_56, %c0_57, %c0_58, %c0_59], %104 {strides = array<i32>} : memref<8x3x8x16xbf16, #tpu.memory_space<vmem>>, vector<1x3x8x16xbf16>,
    %c3_60 = arith.constant 3 : index
    %c3_61 = arith.constant 3 : index
    %c0_62 = arith.constant 0 : index
    %c0_63 = arith.constant 0 : index
    %105 = vector.load %arg2[%c3_60, %c3_61, %c0_62, %c0_63] : memref<8x4x8x16xf32, #tpu.memory_space<vmem>>, vector<1x1x8x16xf32>
    %106 = vector.shape_cast %105 : vector<1x1x8x16xf32> to vector<8x16xf32>
    %107 = vector.broadcast %87 : f32 to vector<8x16xf32>
    %108 = arith.mulf %106, %107 : vector<8x16xf32>
    %cst_64 = arith.constant 0.000000e+00 : f32
    %109 = vector.broadcast %cst_64 : f32 to vector<8x16xf32>
    %110 = arith.subf %109, %108 : vector<8x16xf32>
    %111 = math.exp %110 : vector<8x16xf32>
    %cst_65 = arith.constant 1.000000e+00 : f32
    %112 = vector.broadcast %cst_65 : f32 to vector<8x16xf32>
    %113 = arith.addf %112, %111 : vector<8x16xf32>
    %cst_66 = arith.constant 1.000000e+00 : f32
    %114 = vector.broadcast %cst_66 : f32 to vector<8x16xf32>
    %115 = arith.divf %114, %113 : vector<8x16xf32>
    %c4 = arith.constant 4 : index
    %116 = memref.load %arg1[%c4] : memref<8xf32, #tpu.memory_space<smem>>
    %c4_67 = arith.constant 4 : index
    %c0_68 = arith.constant 0 : index
    %c0_69 = arith.constant 0 : index
    %c0_70 = arith.constant 0 : index
    %117 = vector.load %arg2[%c4_67, %c0_68, %c0_69, %c0_70] : memref<8x4x8x16xf32, #tpu.memory_space<vmem>>, vector<1x3x8x16xf32>
    %118 = vector.shape_cast %117 : vector<1x3x8x16xf32> to vector<3x8x16xf32>
    %119 = vector.broadcast %116 : f32 to vector<3x8x16xf32>
    %120 = arith.mulf %118, %119 : vector<3x8x16xf32>
    %cst_71 = arith.constant dense<0xFF800000> : vector<8x16xf32>
    %121 = vector.multi_reduction <maximumf>, %120, %cst_71 [0] : vector<3x8x16xf32> to vector<8x16xf32>
    %122 = vector.shape_cast %121 : vector<8x16xf32> to vector<1x8x16xf32>
    %123 = vector.broadcast %122 : vector<1x8x16xf32> to vector<3x8x16xf32>
    %124 = arith.subf %120, %123 : vector<3x8x16xf32>
    %125 = math.exp %124 : vector<3x8x16xf32>
    %cst_72 = arith.constant dense<0.000000e+00> : vector<8x16xf32>
    %126 = vector.multi_reduction <add>, %125, %cst_72 [0] : vector<3x8x16xf32> to vector<8x16xf32>
    %127 = vector.shape_cast %126 : vector<8x16xf32> to vector<1x8x16xf32>
    %128 = vector.broadcast %127 : vector<1x8x16xf32> to vector<3x8x16xf32>
    %129 = arith.divf %125, %128 : vector<3x8x16xf32>
    %130 = arith.truncf %129 : vector<3x8x16xf32> to vector<3x8x16xbf16>
    %c4_73 = arith.constant 4 : index
    %c0_74 = arith.constant 0 : index
    %c0_75 = arith.constant 0 : index
    %c0_76 = arith.constant 0 : index
    %131 = vector.load %arg5[%c4_73, %c0_74, %c0_75, %c0_76] : memref<8x3x8x16xbf16, #tpu.memory_space<vmem>>, vector<1x3x8x16xbf16>
    %132 = vector.shape_cast %131 : vector<1x3x8x16xbf16> to vector<3x8x16xbf16>
    %133 = vector.shape_cast %130 : vector<3x8x16xbf16> to vector<1x3x8x16xbf16>
    tpu.vector_store %arg5[%c4_73, %c0_74, %c0_75, %c0_76], %133 {strides = array<i32>} : memref<8x3x8x16xbf16, #tpu.memory_space<vmem>>, vector<1x3x8x16xbf16>,
    %c4_77 = arith.constant 4 : index
    %c3_78 = arith.constant 3 : index
    %c0_79 = arith.constant 0 : index
    %c0_80 = arith.constant 0 : index
    %134 = vector.load %arg2[%c4_77, %c3_78, %c0_79, %c0_80] : memref<8x4x8x16xf32, #tpu.memory_space<vmem>>, vector<1x1x8x16xf32>
    %135 = vector.shape_cast %134 : vector<1x1x8x16xf32> to vector<8x16xf32>
    %136 = vector.broadcast %116 : f32 to vector<8x16xf32>
    %137 = arith.mulf %135, %136 : vector<8x16xf32>
    %cst_81 = arith.constant 0.000000e+00 : f32
    %138 = vector.broadcast %cst_81 : f32 to vector<8x16xf32>
    %139 = arith.subf %138, %137 : vector<8x16xf32>
    %140 = math.exp %139 : vector<8x16xf32>
    %cst_82 = arith.constant 1.000000e+00 : f32
    %141 = vector.broadcast %cst_82 : f32 to vector<8x16xf32>
    %142 = arith.addf %141, %140 : vector<8x16xf32>
    %cst_83 = arith.constant 1.000000e+00 : f32
    %143 = vector.broadcast %cst_83 : f32 to vector<8x16xf32>
    %144 = arith.divf %143, %142 : vector<8x16xf32>
    %c5 = arith.constant 5 : index
    %145 = memref.load %arg1[%c5] : memref<8xf32, #tpu.memory_space<smem>>
    %c5_84 = arith.constant 5 : index
    %c0_85 = arith.constant 0 : index
    %c0_86 = arith.constant 0 : index
    %c0_87 = arith.constant 0 : index
    %146 = vector.load %arg2[%c5_84, %c0_85, %c0_86, %c0_87] : memref<8x4x8x16xf32, #tpu.memory_space<vmem>>, vector<1x3x8x16xf32>
    %147 = vector.shape_cast %146 : vector<1x3x8x16xf32> to vector<3x8x16xf32>
    %148 = vector.broadcast %145 : f32 to vector<3x8x16xf32>
    %149 = arith.mulf %147, %148 : vector<3x8x16xf32>
    %cst_88 = arith.constant dense<0xFF800000> : vector<8x16xf32>
    %150 = vector.multi_reduction <maximumf>, %149, %cst_88 [0] : vector<3x8x16xf32> to vector<8x16xf32>
    %151 = vector.shape_cast %150 : vector<8x16xf32> to vector<1x8x16xf32>
    %152 = vector.broadcast %151 : vector<1x8x16xf32> to vector<3x8x16xf32>
    %153 = arith.subf %149, %152 : vector<3x8x16xf32>
    %154 = math.exp %153 : vector<3x8x16xf32>
    %cst_89 = arith.constant dense<0.000000e+00> : vector<8x16xf32>
    %155 = vector.multi_reduction <add>, %154, %cst_89 [0] : vector<3x8x16xf32> to vector<8x16xf32>
    %156 = vector.shape_cast %155 : vector<8x16xf32> to vector<1x8x16xf32>
    %157 = vector.broadcast %156 : vector<1x8x16xf32> to vector<3x8x16xf32>
    %158 = arith.divf %154, %157 : vector<3x8x16xf32>
    %159 = arith.truncf %158 : vector<3x8x16xf32> to vector<3x8x16xbf16>
    %c5_90 = arith.constant 5 : index
    %c0_91 = arith.constant 0 : index
    %c0_92 = arith.constant 0 : index
    %c0_93 = arith.constant 0 : index
    %160 = vector.load %arg5[%c5_90, %c0_91, %c0_92, %c0_93] : memref<8x3x8x16xbf16, #tpu.memory_space<vmem>>, vector<1x3x8x16xbf16>
    %161 = vector.shape_cast %160 : vector<1x3x8x16xbf16> to vector<3x8x16xbf16>
    %162 = vector.shape_cast %159 : vector<3x8x16xbf16> to vector<1x3x8x16xbf16>
    tpu.vector_store %arg5[%c5_90, %c0_91, %c0_92, %c0_93], %162 {strides = array<i32>} : memref<8x3x8x16xbf16, #tpu.memory_space<vmem>>, vector<1x3x8x16xbf16>,
    %c5_94 = arith.constant 5 : index
    %c3_95 = arith.constant 3 : index
    %c0_96 = arith.constant 0 : index
    %c0_97 = arith.constant 0 : index
    %163 = vector.load %arg2[%c5_94, %c3_95, %c0_96, %c0_97] : memref<8x4x8x16xf32, #tpu.memory_space<vmem>>, vector<1x1x8x16xf32>
    %164 = vector.shape_cast %163 : vector<1x1x8x16xf32> to vector<8x16xf32>
    %165 = vector.broadcast %145 : f32 to vector<8x16xf32>
    %166 = arith.mulf %164, %165 : vector<8x16xf32>
    %cst_98 = arith.constant 0.000000e+00 : f32
    %167 = vector.broadcast %cst_98 : f32 to vector<8x16xf32>
    %168 = arith.subf %167, %166 : vector<8x16xf32>
    %169 = math.exp %168 : vector<8x16xf32>
    %cst_99 = arith.constant 1.000000e+00 : f32
    %170 = vector.broadcast %cst_99 : f32 to vector<8x16xf32>
    %171 = arith.addf %170, %169 : vector<8x16xf32>
    %cst_100 = arith.constant 1.000000e+00 : f32
    %172 = vector.broadcast %cst_100 : f32 to vector<8x16xf32>
    %173 = arith.divf %172, %171 : vector<8x16xf32>
    %c6 = arith.constant 6 : index
    %174 = memref.load %arg1[%c6] : memref<8xf32, #tpu.memory_space<smem>>
    %c6_101 = arith.constant 6 : index
    %c0_102 = arith.constant 0 : index
    %c0_103 = arith.constant 0 : index
    %c0_104 = arith.constant 0 : index
    %175 = vector.load %arg2[%c6_101, %c0_102, %c0_103, %c0_104] : memref<8x4x8x16xf32, #tpu.memory_space<vmem>>, vector<1x3x8x16xf32>
    %176 = vector.shape_cast %175 : vector<1x3x8x16xf32> to vector<3x8x16xf32>
    %177 = vector.broadcast %174 : f32 to vector<3x8x16xf32>
    %178 = arith.mulf %176, %177 : vector<3x8x16xf32>
    %cst_105 = arith.constant dense<0xFF800000> : vector<8x16xf32>
    %179 = vector.multi_reduction <maximumf>, %178, %cst_105 [0] : vector<3x8x16xf32> to vector<8x16xf32>
    %180 = vector.shape_cast %179 : vector<8x16xf32> to vector<1x8x16xf32>
    %181 = vector.broadcast %180 : vector<1x8x16xf32> to vector<3x8x16xf32>
    %182 = arith.subf %178, %181 : vector<3x8x16xf32>
    %183 = math.exp %182 : vector<3x8x16xf32>
    %cst_106 = arith.constant dense<0.000000e+00> : vector<8x16xf32>
    %184 = vector.multi_reduction <add>, %183, %cst_106 [0] : vector<3x8x16xf32> to vector<8x16xf32>
    %185 = vector.shape_cast %184 : vector<8x16xf32> to vector<1x8x16xf32>
    %186 = vector.broadcast %185 : vector<1x8x16xf32> to vector<3x8x16xf32>
    %187 = arith.divf %183, %186 : vector<3x8x16xf32>
    %188 = arith.truncf %187 : vector<3x8x16xf32> to vector<3x8x16xbf16>
    %c6_107 = arith.constant 6 : index
    %c0_108 = arith.constant 0 : index
    %c0_109 = arith.constant 0 : index
    %c0_110 = arith.constant 0 : index
    %189 = vector.load %arg5[%c6_107, %c0_108, %c0_109, %c0_110] : memref<8x3x8x16xbf16, #tpu.memory_space<vmem>>, vector<1x3x8x16xbf16>
    %190 = vector.shape_cast %189 : vector<1x3x8x16xbf16> to vector<3x8x16xbf16>
    %191 = vector.shape_cast %188 : vector<3x8x16xbf16> to vector<1x3x8x16xbf16>
    tpu.vector_store %arg5[%c6_107, %c0_108, %c0_109, %c0_110], %191 {strides = array<i32>} : memref<8x3x8x16xbf16, #tpu.memory_space<vmem>>, vector<1x3x8x16xbf16>,
    %c6_111 = arith.constant 6 : index
    %c3_112 = arith.constant 3 : index
    %c0_113 = arith.constant 0 : index
    %c0_114 = arith.constant 0 : index
    %192 = vector.load %arg2[%c6_111, %c3_112, %c0_113, %c0_114] : memref<8x4x8x16xf32, #tpu.memory_space<vmem>>, vector<1x1x8x16xf32>
    %193 = vector.shape_cast %192 : vector<1x1x8x16xf32> to vector<8x16xf32>
    %194 = vector.broadcast %174 : f32 to vector<8x16xf32>
    %195 = arith.mulf %193, %194 : vector<8x16xf32>
    %cst_115 = arith.constant 0.000000e+00 : f32
    %196 = vector.broadcast %cst_115 : f32 to vector<8x16xf32>
    %197 = arith.subf %196, %195 : vector<8x16xf32>
    %198 = math.exp %197 : vector<8x16xf32>
    %cst_116 = arith.constant 1.000000e+00 : f32
    %199 = vector.broadcast %cst_116 : f32 to vector<8x16xf32>
    %200 = arith.addf %199, %198 : vector<8x16xf32>
    %cst_117 = arith.constant 1.000000e+00 : f32
    %201 = vector.broadcast %cst_117 : f32 to vector<8x16xf32>
    %202 = arith.divf %201, %200 : vector<8x16xf32>
    %c7 = arith.constant 7 : index
    %203 = memref.load %arg1[%c7] : memref<8xf32, #tpu.memory_space<smem>>
    %c7_118 = arith.constant 7 : index
    %c0_119 = arith.constant 0 : index
    %c0_120 = arith.constant 0 : index
    %c0_121 = arith.constant 0 : index
    %204 = vector.load %arg2[%c7_118, %c0_119, %c0_120, %c0_121] : memref<8x4x8x16xf32, #tpu.memory_space<vmem>>, vector<1x3x8x16xf32>
    %205 = vector.shape_cast %204 : vector<1x3x8x16xf32> to vector<3x8x16xf32>
    %206 = vector.broadcast %203 : f32 to vector<3x8x16xf32>
    %207 = arith.mulf %205, %206 : vector<3x8x16xf32>
    %cst_122 = arith.constant dense<0xFF800000> : vector<8x16xf32>
    %208 = vector.multi_reduction <maximumf>, %207, %cst_122 [0] : vector<3x8x16xf32> to vector<8x16xf32>
    %209 = vector.shape_cast %208 : vector<8x16xf32> to vector<1x8x16xf32>
    %210 = vector.broadcast %209 : vector<1x8x16xf32> to vector<3x8x16xf32>
    %211 = arith.subf %207, %210 : vector<3x8x16xf32>
    %212 = math.exp %211 : vector<3x8x16xf32>
    %cst_123 = arith.constant dense<0.000000e+00> : vector<8x16xf32>
    %213 = vector.multi_reduction <add>, %212, %cst_123 [0] : vector<3x8x16xf32> to vector<8x16xf32>
    %214 = vector.shape_cast %213 : vector<8x16xf32> to vector<1x8x16xf32>
    %215 = vector.broadcast %214 : vector<1x8x16xf32> to vector<3x8x16xf32>
    %216 = arith.divf %212, %215 : vector<3x8x16xf32>
    %217 = arith.truncf %216 : vector<3x8x16xf32> to vector<3x8x16xbf16>
    %c7_124 = arith.constant 7 : index
    %c0_125 = arith.constant 0 : index
    %c0_126 = arith.constant 0 : index
    %c0_127 = arith.constant 0 : index
    %218 = vector.load %arg5[%c7_124, %c0_125, %c0_126, %c0_127] : memref<8x3x8x16xbf16, #tpu.memory_space<vmem>>, vector<1x3x8x16xbf16>
    %219 = vector.shape_cast %218 : vector<1x3x8x16xbf16> to vector<3x8x16xbf16>
    %220 = vector.shape_cast %217 : vector<3x8x16xbf16> to vector<1x3x8x16xbf16>
    tpu.vector_store %arg5[%c7_124, %c0_125, %c0_126, %c0_127], %220 {strides = array<i32>} : memref<8x3x8x16xbf16, #tpu.memory_space<vmem>>, vector<1x3x8x16xbf16>,
    %c7_128 = arith.constant 7 : index
    %c3_129 = arith.constant 3 : index
    %c0_130 = arith.constant 0 : index
    %c0_131 = arith.constant 0 : index
    %221 = vector.load %arg2[%c7_128, %c3_129, %c0_130, %c0_131] : memref<8x4x8x16xf32, #tpu.memory_space<vmem>>, vector<1x1x8x16xf32>
    %222 = vector.shape_cast %221 : vector<1x1x8x16xf32> to vector<8x16xf32>
    %223 = vector.broadcast %203 : f32 to vector<8x16xf32>
    %224 = arith.mulf %222, %223 : vector<8x16xf32>
    %cst_132 = arith.constant 0.000000e+00 : f32
    %225 = vector.broadcast %cst_132 : f32 to vector<8x16xf32>
    %226 = arith.subf %225, %224 : vector<8x16xf32>
    %227 = math.exp %226 : vector<8x16xf32>
    %cst_133 = arith.constant 1.000000e+00 : f32
    %228 = vector.broadcast %cst_133 : f32 to vector<8x16xf32>
    %229 = arith.addf %228, %227 : vector<8x16xf32>
    %cst_134 = arith.constant 1.000000e+00 : f32
    %230 = vector.broadcast %cst_134 : f32 to vector<8x16xf32>
    %231 = arith.divf %230, %229 : vector<8x16xf32>
    %cst_135 = arith.constant 2.000000e-01 : f32
    %232 = vector.broadcast %cst_135 : f32 to vector<8x16xf32>
    %233 = arith.mulf %232, %28 : vector<8x16xf32>
    %cst_136 = arith.constant 3.000000e-01 : f32
    %234 = vector.broadcast %cst_136 : f32 to vector<8x16xf32>
    %235 = arith.mulf %234, %57 : vector<8x16xf32>
    %236 = arith.addf %233, %235 : vector<8x16xf32>
    %cst_137 = arith.constant 5.000000e-01 : f32
    %237 = vector.broadcast %cst_137 : f32 to vector<8x16xf32>
    %238 = arith.mulf %237, %86 : vector<8x16xf32>
    %239 = arith.addf %236, %238 : vector<8x16xf32>
    %cst_138 = arith.constant 2.000000e-01 : f32
    %240 = vector.broadcast %cst_138 : f32 to vector<8x16xf32>
    %241 = arith.mulf %240, %57 : vector<8x16xf32>
    %cst_139 = arith.constant 3.000000e-01 : f32
    %242 = vector.broadcast %cst_139 : f32 to vector<8x16xf32>
    %243 = arith.mulf %242, %239 : vector<8x16xf32>
    %244 = arith.addf %241, %243 : vector<8x16xf32>
    %cst_140 = arith.constant 5.000000e-01 : f32
    %245 = vector.broadcast %cst_140 : f32 to vector<8x16xf32>
    %246 = arith.mulf %245, %115 : vector<8x16xf32>
    %247 = arith.addf %244, %246 : vector<8x16xf32>
    %cst_141 = arith.constant 2.000000e-01 : f32
    %248 = vector.broadcast %cst_141 : f32 to vector<8x16xf32>
    %249 = arith.mulf %248, %239 : vector<8x16xf32>
    %cst_142 = arith.constant 3.000000e-01 : f32
    %250 = vector.broadcast %cst_142 : f32 to vector<8x16xf32>
    %251 = arith.mulf %250, %247 : vector<8x16xf32>
    %252 = arith.addf %249, %251 : vector<8x16xf32>
    %cst_143 = arith.constant 5.000000e-01 : f32
    %253 = vector.broadcast %cst_143 : f32 to vector<8x16xf32>
    %254 = arith.mulf %253, %144 : vector<8x16xf32>
    %255 = arith.addf %252, %254 : vector<8x16xf32>
    %cst_144 = arith.constant 2.000000e-01 : f32
    %256 = vector.broadcast %cst_144 : f32 to vector<8x16xf32>
    %257 = arith.mulf %256, %247 : vector<8x16xf32>
    %cst_145 = arith.constant 3.000000e-01 : f32
    %258 = vector.broadcast %cst_145 : f32 to vector<8x16xf32>
    %259 = arith.mulf %258, %255 : vector<8x16xf32>
    %260 = arith.addf %257, %259 : vector<8x16xf32>
    %cst_146 = arith.constant 5.000000e-01 : f32
    %261 = vector.broadcast %cst_146 : f32 to vector<8x16xf32>
    %262 = arith.mulf %261, %173 : vector<8x16xf32>
    %263 = arith.addf %260, %262 : vector<8x16xf32>
    %cst_147 = arith.constant 2.000000e-01 : f32
    %264 = vector.broadcast %cst_147 : f32 to vector<8x16xf32>
    %265 = arith.mulf %264, %255 : vector<8x16xf32>
    %cst_148 = arith.constant 3.000000e-01 : f32
    %266 = vector.broadcast %cst_148 : f32 to vector<8x16xf32>
    %267 = arith.mulf %266, %263 : vector<8x16xf32>
    %268 = arith.addf %265, %267 : vector<8x16xf32>
    %cst_149 = arith.constant 5.000000e-01 : f32
    %269 = vector.broadcast %cst_149 : f32 to vector<8x16xf32>
    %270 = arith.mulf %269, %202 : vector<8x16xf32>
    %271 = arith.addf %268, %270 : vector<8x16xf32>
    %cst_150 = arith.constant 2.000000e-01 : f32
    %272 = vector.broadcast %cst_150 : f32 to vector<8x16xf32>
    %273 = arith.mulf %272, %263 : vector<8x16xf32>
    %cst_151 = arith.constant 3.000000e-01 : f32
    %274 = vector.broadcast %cst_151 : f32 to vector<8x16xf32>
    %275 = arith.mulf %274, %271 : vector<8x16xf32>
    %276 = arith.addf %273, %275 : vector<8x16xf32>
    %cst_152 = arith.constant 5.000000e-01 : f32
    %277 = vector.broadcast %cst_152 : f32 to vector<8x16xf32>
    %278 = arith.mulf %277, %231 : vector<8x16xf32>
    %279 = arith.addf %276, %278 : vector<8x16xf32>
    %cst_153 = arith.constant 2.000000e-01 : f32
    %280 = vector.broadcast %cst_153 : f32 to vector<8x16xf32>
    %281 = arith.mulf %280, %231 : vector<8x16xf32>
    %cst_154 = arith.constant 3.000000e-01 : f32
    %282 = vector.broadcast %cst_154 : f32 to vector<8x16xf32>
    %283 = arith.mulf %282, %202 : vector<8x16xf32>
    %284 = arith.addf %281, %283 : vector<8x16xf32>
    %cst_155 = arith.constant 5.000000e-01 : f32
    %285 = vector.broadcast %cst_155 : f32 to vector<8x16xf32>
    %286 = arith.mulf %285, %173 : vector<8x16xf32>
    %287 = arith.addf %284, %286 : vector<8x16xf32>
    %cst_156 = arith.constant 2.000000e-01 : f32
    %288 = vector.broadcast %cst_156 : f32 to vector<8x16xf32>
    %289 = arith.mulf %288, %202 : vector<8x16xf32>
    %cst_157 = arith.constant 3.000000e-01 : f32
    %290 = vector.broadcast %cst_157 : f32 to vector<8x16xf32>
    %291 = arith.mulf %290, %287 : vector<8x16xf32>
    %292 = arith.addf %289, %291 : vector<8x16xf32>
    %cst_158 = arith.constant 5.000000e-01 : f32
    %293 = vector.broadcast %cst_158 : f32 to vector<8x16xf32>
    %294 = arith.mulf %293, %144 : vector<8x16xf32>
    %295 = arith.addf %292, %294 : vector<8x16xf32>
    %cst_159 = arith.constant 2.000000e-01 : f32
    %296 = vector.broadcast %cst_159 : f32 to vector<8x16xf32>
    %297 = arith.mulf %296, %287 : vector<8x16xf32>
    %cst_160 = arith.constant 3.000000e-01 : f32
    %298 = vector.broadcast %cst_160 : f32 to vector<8x16xf32>
    %299 = arith.mulf %298, %295 : vector<8x16xf32>
    %300 = arith.addf %297, %299 : vector<8x16xf32>
    %cst_161 = arith.constant 5.000000e-01 : f32
    %301 = vector.broadcast %cst_161 : f32 to vector<8x16xf32>
    %302 = arith.mulf %301, %115 : vector<8x16xf32>
    %303 = arith.addf %300, %302 : vector<8x16xf32>
    %cst_162 = arith.constant 2.000000e-01 : f32
    %304 = vector.broadcast %cst_162 : f32 to vector<8x16xf32>
    %305 = arith.mulf %304, %295 : vector<8x16xf32>
    %cst_163 = arith.constant 3.000000e-01 : f32
    %306 = vector.broadcast %cst_163 : f32 to vector<8x16xf32>
    %307 = arith.mulf %306, %303 : vector<8x16xf32>
    %308 = arith.addf %305, %307 : vector<8x16xf32>
    %cst_164 = arith.constant 5.000000e-01 : f32
    %309 = vector.broadcast %cst_164 : f32 to vector<8x16xf32>
    %310 = arith.mulf %309, %86 : vector<8x16xf32>
    %311 = arith.addf %308, %310 : vector<8x16xf32>
    %cst_165 = arith.constant 2.000000e-01 : f32
    %312 = vector.broadcast %cst_165 : f32 to vector<8x16xf32>
    %313 = arith.mulf %312, %303 : vector<8x16xf32>
    %cst_166 = arith.constant 3.000000e-01 : f32
    %314 = vector.broadcast %cst_166 : f32 to vector<8x16xf32>
    %315 = arith.mulf %314, %311 : vector<8x16xf32>
    %316 = arith.addf %313, %315 : vector<8x16xf32>
    %cst_167 = arith.constant 5.000000e-01 : f32
    %317 = vector.broadcast %cst_167 : f32 to vector<8x16xf32>
    %318 = arith.mulf %317, %57 : vector<8x16xf32>
    %319 = arith.addf %316, %318 : vector<8x16xf32>
    %cst_168 = arith.constant 2.000000e-01 : f32
    %320 = vector.broadcast %cst_168 : f32 to vector<8x16xf32>
    %321 = arith.mulf %320, %311 : vector<8x16xf32>
    %cst_169 = arith.constant 3.000000e-01 : f32
    %322 = vector.broadcast %cst_169 : f32 to vector<8x16xf32>
    %323 = arith.mulf %322, %319 : vector<8x16xf32>
    %324 = arith.addf %321, %323 : vector<8x16xf32>
    %cst_170 = arith.constant 5.000000e-01 : f32
    %325 = vector.broadcast %cst_170 : f32 to vector<8x16xf32>
    %326 = arith.mulf %325, %28 : vector<8x16xf32>
    %327 = arith.addf %324, %326 : vector<8x16xf32>
    %328 = arith.addf %28, %327 : vector<8x16xf32>
    %cst_171 = arith.constant 5.000000e-01 : f32
    %329 = vector.broadcast %cst_171 : f32 to vector<8x16xf32>
    %330 = arith.mulf %328, %329 : vector<8x16xf32>
    %cst_172 = arith.constant 1.200000e-01 : f32
    %331 = vector.broadcast %cst_172 : f32 to vector<8x16xf32>
    %332 = arith.cmpf olt, %330, %331 : vector<8x16xf32>
    %cst_173 = arith.constant 0.000000e+00 : f32
    %cst_174 = arith.constant 1.000000e+00 : f32
    %333 = vector.broadcast %cst_173 : f32 to vector<8x16xf32>
    %334 = vector.broadcast %cst_174 : f32 to vector<8x16xf32>
    %335 = arith.select %332, %333, %334 : vector<8x16xi1>, vector<8x16xf32>
    %c0_175 = arith.constant 0 : index
    %c0_176 = arith.constant 0 : index
    %c0_177 = arith.constant 0 : index
    %336 = vector.load %arg4[%c0_175, %c0_176, %c0_177] : memref<8x8x16xf32, #tpu.memory_space<vmem>>, vector<1x8x16xf32>
    %337 = vector.shape_cast %336 : vector<1x8x16xf32> to vector<8x16xf32>
    %338 = vector.shape_cast %335 : vector<8x16xf32> to vector<1x8x16xf32>
    tpu.vector_store %arg4[%c0_175, %c0_176, %c0_177], %338 {strides = array<i32>} : memref<8x8x16xf32, #tpu.memory_space<vmem>>, vector<1x8x16xf32>,
    %339 = arith.addf %57, %319 : vector<8x16xf32>
    %cst_178 = arith.constant 5.000000e-01 : f32
    %340 = vector.broadcast %cst_178 : f32 to vector<8x16xf32>
    %341 = arith.mulf %339, %340 : vector<8x16xf32>
    %cst_179 = arith.constant 1.200000e-01 : f32
    %342 = vector.broadcast %cst_179 : f32 to vector<8x16xf32>
    %343 = arith.cmpf olt, %341, %342 : vector<8x16xf32>
    %cst_180 = arith.constant 0.000000e+00 : f32
    %cst_181 = arith.constant 1.000000e+00 : f32
    %344 = vector.broadcast %cst_180 : f32 to vector<8x16xf32>
    %345 = vector.broadcast %cst_181 : f32 to vector<8x16xf32>
    %346 = arith.select %343, %344, %345 : vector<8x16xi1>, vector<8x16xf32>
    %c1_182 = arith.constant 1 : index
    %c0_183 = arith.constant 0 : index
    %c0_184 = arith.constant 0 : index
    %347 = vector.load %arg4[%c1_182, %c0_183, %c0_184] : memref<8x8x16xf32, #tpu.memory_space<vmem>>, vector<1x8x16xf32>
    %348 = vector.shape_cast %347 : vector<1x8x16xf32> to vector<8x16xf32>
    %349 = vector.shape_cast %346 : vector<8x16xf32> to vector<1x8x16xf32>
    tpu.vector_store %arg4[%c1_182, %c0_183, %c0_184], %349 {strides = array<i32>} : memref<8x8x16xf32, #tpu.memory_space<vmem>>, vector<1x8x16xf32>,
    %350 = arith.addf %239, %311 : vector<8x16xf32>
    %cst_185 = arith.constant 5.000000e-01 : f32
    %351 = vector.broadcast %cst_185 : f32 to vector<8x16xf32>
    %352 = arith.mulf %350, %351 : vector<8x16xf32>
    %cst_186 = arith.constant 1.200000e-01 : f32
    %353 = vector.broadcast %cst_186 : f32 to vector<8x16xf32>
    %354 = arith.cmpf olt, %352, %353 : vector<8x16xf32>
    %cst_187 = arith.constant 0.000000e+00 : f32
    %cst_188 = arith.constant 1.000000e+00 : f32
    %355 = vector.broadcast %cst_187 : f32 to vector<8x16xf32>
    %356 = vector.broadcast %cst_188 : f32 to vector<8x16xf32>
    %357 = arith.select %354, %355, %356 : vector<8x16xi1>, vector<8x16xf32>
    %c2_189 = arith.constant 2 : index
    %c0_190 = arith.constant 0 : index
    %c0_191 = arith.constant 0 : index
    %358 = vector.load %arg4[%c2_189, %c0_190, %c0_191] : memref<8x8x16xf32, #tpu.memory_space<vmem>>, vector<1x8x16xf32>
    %359 = vector.shape_cast %358 : vector<1x8x16xf32> to vector<8x16xf32>
    %360 = vector.shape_cast %357 : vector<8x16xf32> to vector<1x8x16xf32>
    tpu.vector_store %arg4[%c2_189, %c0_190, %c0_191], %360 {strides = array<i32>} : memref<8x8x16xf32, #tpu.memory_space<vmem>>, vector<1x8x16xf32>,
    %361 = arith.addf %247, %303 : vector<8x16xf32>
    %cst_192 = arith.constant 5.000000e-01 : f32
    %362 = vector.broadcast %cst_192 : f32 to vector<8x16xf32>
    %363 = arith.mulf %361, %362 : vector<8x16xf32>
    %cst_193 = arith.constant 1.200000e-01 : f32
    %364 = vector.broadcast %cst_193 : f32 to vector<8x16xf32>
    %365 = arith.cmpf olt, %363, %364 : vector<8x16xf32>
    %cst_194 = arith.constant 0.000000e+00 : f32
    %cst_195 = arith.constant 1.000000e+00 : f32
    %366 = vector.broadcast %cst_194 : f32 to vector<8x16xf32>
    %367 = vector.broadcast %cst_195 : f32 to vector<8x16xf32>
    %368 = arith.select %365, %366, %367 : vector<8x16xi1>, vector<8x16xf32>
    %c3_196 = arith.constant 3 : index
    %c0_197 = arith.constant 0 : index
    %c0_198 = arith.constant 0 : index
    %369 = vector.load %arg4[%c3_196, %c0_197, %c0_198] : memref<8x8x16xf32, #tpu.memory_space<vmem>>, vector<1x8x16xf32>
    %370 = vector.shape_cast %369 : vector<1x8x16xf32> to vector<8x16xf32>
    %371 = vector.shape_cast %368 : vector<8x16xf32> to vector<1x8x16xf32>
    tpu.vector_store %arg4[%c3_196, %c0_197, %c0_198], %371 {strides = array<i32>} : memref<8x8x16xf32, #tpu.memory_space<vmem>>, vector<1x8x16xf32>,
    %372 = arith.addf %255, %295 : vector<8x16xf32>
    %cst_199 = arith.constant 5.000000e-01 : f32
    %373 = vector.broadcast %cst_199 : f32 to vector<8x16xf32>
    %374 = arith.mulf %372, %373 : vector<8x16xf32>
    %cst_200 = arith.constant 1.200000e-01 : f32
    %375 = vector.broadcast %cst_200 : f32 to vector<8x16xf32>
    %376 = arith.cmpf olt, %374, %375 : vector<8x16xf32>
    %cst_201 = arith.constant 0.000000e+00 : f32
    %cst_202 = arith.constant 1.000000e+00 : f32
    %377 = vector.broadcast %cst_201 : f32 to vector<8x16xf32>
    %378 = vector.broadcast %cst_202 : f32 to vector<8x16xf32>
    %379 = arith.select %376, %377, %378 : vector<8x16xi1>, vector<8x16xf32>
    %c4_203 = arith.constant 4 : index
    %c0_204 = arith.constant 0 : index
    %c0_205 = arith.constant 0 : index
    %380 = vector.load %arg4[%c4_203, %c0_204, %c0_205] : memref<8x8x16xf32, #tpu.memory_space<vmem>>, vector<1x8x16xf32>
    %381 = vector.shape_cast %380 : vector<1x8x16xf32> to vector<8x16xf32>
    %382 = vector.shape_cast %379 : vector<8x16xf32> to vector<1x8x16xf32>
    tpu.vector_store %arg4[%c4_203, %c0_204, %c0_205], %382 {strides = array<i32>} : memref<8x8x16xf32, #tpu.memory_space<vmem>>, vector<1x8x16xf32>,
    %383 = arith.addf %263, %287 : vector<8x16xf32>
    %cst_206 = arith.constant 5.000000e-01 : f32
    %384 = vector.broadcast %cst_206 : f32 to vector<8x16xf32>
    %385 = arith.mulf %383, %384 : vector<8x16xf32>
    %cst_207 = arith.constant 1.200000e-01 : f32
    %386 = vector.broadcast %cst_207 : f32 to vector<8x16xf32>
    %387 = arith.cmpf olt, %385, %386 : vector<8x16xf32>
    %cst_208 = arith.constant 0.000000e+00 : f32
    %cst_209 = arith.constant 1.000000e+00 : f32
    %388 = vector.broadcast %cst_208 : f32 to vector<8x16xf32>
    %389 = vector.broadcast %cst_209 : f32 to vector<8x16xf32>
    %390 = arith.select %387, %388, %389 : vector<8x16xi1>, vector<8x16xf32>
    %c5_210 = arith.constant 5 : index
    %c0_211 = arith.constant 0 : index
    %c0_212 = arith.constant 0 : index
    %391 = vector.load %arg4[%c5_210, %c0_211, %c0_212] : memref<8x8x16xf32, #tpu.memory_space<vmem>>, vector<1x8x16xf32>
    %392 = vector.shape_cast %391 : vector<1x8x16xf32> to vector<8x16xf32>
    %393 = vector.shape_cast %390 : vector<8x16xf32> to vector<1x8x16xf32>
    tpu.vector_store %arg4[%c5_210, %c0_211, %c0_212], %393 {strides = array<i32>} : memref<8x8x16xf32, #tpu.memory_space<vmem>>, vector<1x8x16xf32>,
    %394 = arith.addf %271, %202 : vector<8x16xf32>
    %cst_213 = arith.constant 5.000000e-01 : f32
    %395 = vector.broadcast %cst_213 : f32 to vector<8x16xf32>
    %396 = arith.mulf %394, %395 : vector<8x16xf32>
    %cst_214 = arith.constant 1.200000e-01 : f32
    %397 = vector.broadcast %cst_214 : f32 to vector<8x16xf32>
    %398 = arith.cmpf olt, %396, %397 : vector<8x16xf32>
    %cst_215 = arith.constant 0.000000e+00 : f32
    %cst_216 = arith.constant 1.000000e+00 : f32
    %399 = vector.broadcast %cst_215 : f32 to vector<8x16xf32>
    %400 = vector.broadcast %cst_216 : f32 to vector<8x16xf32>
    %401 = arith.select %398, %399, %400 : vector<8x16xi1>, vector<8x16xf32>
    %c6_217 = arith.constant 6 : index
    %c0_218 = arith.constant 0 : index
    %c0_219 = arith.constant 0 : index
    %402 = vector.load %arg4[%c6_217, %c0_218, %c0_219] : memref<8x8x16xf32, #tpu.memory_space<vmem>>, vector<1x8x16xf32>
    %403 = vector.shape_cast %402 : vector<1x8x16xf32> to vector<8x16xf32>
    %404 = vector.shape_cast %401 : vector<8x16xf32> to vector<1x8x16xf32>
    tpu.vector_store %arg4[%c6_217, %c0_218, %c0_219], %404 {strides = array<i32>} : memref<8x8x16xf32, #tpu.memory_space<vmem>>, vector<1x8x16xf32>,
    %405 = arith.addf %279, %231 : vector<8x16xf32>
    %cst_220 = arith.constant 5.000000e-01 : f32
    %406 = vector.broadcast %cst_220 : f32 to vector<8x16xf32>
    %407 = arith.mulf %405, %406 : vector<8x16xf32>
    %cst_221 = arith.constant 1.200000e-01 : f32
    %408 = vector.broadcast %cst_221 : f32 to vector<8x16xf32>
    %409 = arith.cmpf olt, %407, %408 : vector<8x16xf32>
    %cst_222 = arith.constant 0.000000e+00 : f32
    %cst_223 = arith.constant 1.000000e+00 : f32
    %410 = vector.broadcast %cst_222 : f32 to vector<8x16xf32>
    %411 = vector.broadcast %cst_223 : f32 to vector<8x16xf32>
    %412 = arith.select %409, %410, %411 : vector<8x16xi1>, vector<8x16xf32>
    %c7_224 = arith.constant 7 : index
    %c0_225 = arith.constant 0 : index
    %c0_226 = arith.constant 0 : index
    %413 = vector.load %arg4[%c7_224, %c0_225, %c0_226] : memref<8x8x16xf32, #tpu.memory_space<vmem>>, vector<1x8x16xf32>
    %414 = vector.shape_cast %413 : vector<1x8x16xf32> to vector<8x16xf32>
    %415 = vector.shape_cast %412 : vector<8x16xf32> to vector<1x8x16xf32>
    tpu.vector_store %arg4[%c7_224, %c0_225, %c0_226], %415 {strides = array<i32>} : memref<8x8x16xf32, #tpu.memory_space<vmem>>, vector<1x8x16xf32>,
    %c0_227 = arith.constant 0 : index
    %c0_228 = arith.constant 0 : index
    %c0_229 = arith.constant 0 : index
    %c0_230 = arith.constant 0 : index
    %416 = vector.load %arg3[%c0_227, %c0_228, %c0_229, %c0_230] : memref<2x8x8x16xf32, #tpu.memory_space<vmem>>, vector<2x8x8x16xf32>
    %417 = math.exp %416 : vector<2x8x8x16xf32>
    %cst_231 = arith.constant 1.000000e+01 : f32
    %418 = vector.broadcast %cst_231 : f32 to vector<2x8x8x16xf32>
    %419 = arith.mulf %417, %418 : vector<2x8x8x16xf32>
    %c0_232 = arith.constant 0 : index
    %c0_233 = arith.constant 0 : index
    %c0_234 = arith.constant 0 : index
    %c0_235 = arith.constant 0 : index
    %420 = vector.load %arg6[%c0_232, %c0_233, %c0_234, %c0_235] : memref<2x8x8x16xf32, #tpu.memory_space<vmem>>, vector<2x8x8x16xf32>
    tpu.vector_store %arg6[%c0_232, %c0_233, %c0_234, %c0_235], %419 {strides = array<i32>} : memref<2x8x8x16xf32, #tpu.memory_space<vmem>>, vector<2x8x8x16xf32>,
    return
  }
  func.func @transform_0(%arg0: i32) -> i32 {
    %c0_i32 = arith.constant 0 : i32
    %c0_i32_0 = arith.constant 0 : i32
    return %c0_i32 : i32
  }
  func.func @transform_1(%arg0: i32) -> (i32, i32, i32, i32) {
    %c0_i32 = arith.constant 0 : i32
    %c0_i32_0 = arith.constant 0 : i32
    %c0_i32_1 = arith.constant 0 : i32
    %c0_i32_2 = arith.constant 0 : i32
    return %c0_i32, %c0_i32_0, %arg0, %c0_i32_1 : i32, i32, i32, i32
  }
  func.func @transform_2(%arg0: i32) -> (i32, i32, i32, i32) {
    %c2_i32 = arith.constant 2 : i32
    %c0_i32 = arith.constant 0 : i32
    %c0_i32_0 = arith.constant 0 : i32
    %c0_i32_1 = arith.constant 0 : i32
    return %c2_i32, %c0_i32, %arg0, %c0_i32_0 : i32, i32, i32, i32
  }
  func.func @transform_3(%arg0: i32) -> (i32, i32, i32) {
    %c0_i32 = arith.constant 0 : i32
    %c0_i32_0 = arith.constant 0 : i32
    %c0_i32_1 = arith.constant 0 : i32
    return %c0_i32, %arg0, %c0_i32_0 : i32, i32, i32
  }
  func.func @transform_4(%arg0: i32) -> (i32, i32, i32, i32) {
    %c0_i32 = arith.constant 0 : i32
    %c0_i32_0 = arith.constant 0 : i32
    %c0_i32_1 = arith.constant 0 : i32
    %c0_i32_2 = arith.constant 0 : i32
    return %c0_i32, %c0_i32_0, %arg0, %c0_i32_1 : i32, i32, i32, i32
  }
  func.func @transform_5(%arg0: i32) -> (i32, i32, i32, i32) {
    %c0_i32 = arith.constant 0 : i32
    %c0_i32_0 = arith.constant 0 : i32
    %c0_i32_1 = arith.constant 0 : i32
    %c0_i32_2 = arith.constant 0 : i32
    return %c0_i32, %c0_i32_0, %arg0, %c0_i32_1 : i32, i32, i32, i32
  }
}

</mosaic_0001>

<bundles_post_ra>
// kernel: fused_inference_forward.1
= control target key start
LH: loop header
LB: loop body
LE: loop exit
PB: predicated region body
PF: predicated region fallthrough
CT: control target
= control target key end

     0   :  { %s2369_s0 = inlined_call_operand.vmem [shape: f32[8], index: 0, kind: input, shape index: {}]   ;;  %s2370_s1 = inlined_call_operand.hbm [shape: f32[8,4,16,16], index: 1, kind: input, shape index: {}]   ;;  %s2371_s2 = inlined_call_operand.hbm [shape: f32[7,8,16,16], index: 2, kind: input, shape index: {}]   ;;  %s2372_s3 = inlined_call_operand.hbm [shape: f32[8,16,16], index: 3, kind: output, shape index: {0}]   ;;  %s2373_s4 = inlined_call_operand.hbm [shape: bf16[8,3,16,16], index: 4, kind: output, shape index: {1}]   ;;  %s2374_s5 = inlined_call_operand.hbm [shape: f32[2,8,16,16], index: 5, kind: output, shape index: {2}]  }
   0x1   :  { %2380 = sst [smem:[#allocation20_spill]] %s2369_s0 }
   0x2   :  { %2381 = sst [smem:[#allocation21_spill]] %s2370_s1 }
   0x3   :  { %11 = vsyncpa [#allocation5], 0 }
   0x4   :  { %12 = vsyncpa [#allocation3], 0 }
   0x5   :  { %14 = vsyncpa [#allocation3 + $0x1], 0 }
   0x6   :  { %15 = vsyncpa [#allocation8], 0 }
   0x7   :  { %17 = vsyncpa [#allocation8 + $0x1], 0 }
   0x8   :  { %18 = vsyncpa [#allocation4], 0 }
   0x9   :  { %20 = vsyncpa [#allocation4 + $0x1], 0 }
   0xa   :  { %21 = vsyncpa [#allocation11], 0 }
   0xb   :  { %23 = vsyncpa [#allocation11 + $0x1], 0  ;;  %s1646_s18 = smov 0   ;;  %s1648_s19 = smov 0  }
   0xc   :  { %s1650_s20 = smov 0   ;;  %s1652_s21 = smov 0  }
   0xd LB: > { %2382 = sst [smem:[#allocation18_spill]] %s1595_s20  ;;  %s1667_s22 = sadd.s32 4294967295, %s1599_s21   ;;  %s1599_s21 = sphi %s1652_s21, %s2404_s21   ;;  %s1595_s20 = sphi %s1650_s20, %s2401_s20   ;;  %s1591_s19 = sphi %s1648_s19, %s2403_s19   ;;  %s1587_s18 = sphi %s1646_s18, %s2402_s18  }
   0xe   : > { %s2377_s23 = sadd.s32 4294967294, %s1599_s21   ;;  %s1671_s24 = sadd.s32 1, %s1599_s21  }
   0xf   : > { %s57_s25 = sadd.s32 1, %s1595_s20  ;;  %s54_s26 = ssub.s32 %s1599_s21, %s1671_s24 }
  0x10   : > { %p64_p0 = scmp.ne.s32.totalorder %s1595_s20, %s1591_s19  ;;  %p55_p1 = scmp.eq.s32.totalorder %s54_s26, 0 }
  0x11   : > { %p65_p2 = scmp.eq.s32.totalorder %s1599_s21, 0  ;;  %p70_p3 = scmp.ne.s32.totalorder %s1591_s19, %s1587_s18 }
  0x12   : > { %p2375_p4 = scmp.eq.s32.totalorder %s1667_s22, 0  ;;  %p120_p7 = scmp.eq.s32.totalorder %s1667_s22, 1 }
  0x13   : > { %s1683_s27 = scalar_select %p55_p1, %s1595_s20, %s57_s25  }
  0x14   : > { %p1685_p5 = por %p65_p2, %p64_p0  ;;  %p1691_p6 = por %p2375_p4, %p70_p3 }
  0x15   : > { %2383 = sst [smem:[#allocation19_spill]] %s1683_s27  ;;  %p126_p8 = scmp.eq.s32.totalorder %s2377_s23, 1 }
  0x16   : > { %s2385_s29 = scalar_select %p1691_p6, 1, 0 }
  0x17   : > { %p1105_p9 = scmp.ge.s32.totalorder %s1599_s21, 1  ;;  %p185_p10 = scmp.lt.s32.totalorder %s1599_s21, 3 }
  0x18   : > { %p1700_p11 = por %p120_p7, %p64_p0  ;;  %p1704_p12 = por %p126_p8, %p70_p3 }
  0x19   : > { %p1708_p13 = pnand %p1105_p9, %p185_p10  ;;  %s2389_s0 = sld [smem:[#allocation20_spill]] }
  0x1a   : > { %s2386_s30 = scalar_select %p1700_p11, 1, 0 }
  0x1b   : > { %s2387_s6 = scalar_select %p1704_p12, 1, 0 }
  0x1c   : > { %p1204_p1 = pneg %p1708_p13  ;;  %p1226_p2 = scmp.lt.s32.totalorder %s1599_s21, 2 }
  0x1d   : > { %s1726_s12 = sand.u32 1, %s1595_s20  }
  0x1e   : > { %p1721_p7 = pnand %p1204_p1, %p2375_p4  ;;  %p1730_p3 = pnand %p1226_p2, %p1685_p5 }
  0x1f   : > { %s198_s10 = sshll.u32 %s2389_s0, 4  ;;  %s1108_s14 = sshll.u32 %s1726_s12, 8  ;;  %s199_s10 = int_to_ptr.vmem [resolvable:$true] %s198_s10 }
  0x20   : > { %s1399_s15 = scalar_lea.vmem %s199_s10, 16  ;;  %p1401_p9 = pneg %p1721_p7 }
  0x21   : > { %p1400_p8 = scmp.ne.s32.totalorder %s199_s10, %s1399_s15  ;;  %p1407_p1 = scmp.lt.s32.totalorder %s199_s10, %s199_s10 }
  0x22   : > { %p1408_p4 = scmp.lt.s32.totalorder %s1399_s15, %s1399_s15 }
  0x23   : > { %p1402_p10 = pnand %p1401_p9, %p1400_p8 }
  0x24   : > { %p1409_p12 = por %p1408_p4, %p1407_p1 }
  0x25   : > { %p1403_p0 = pneg %p1402_p10 }
  0x27   : > { %p1410_p11 = pnand %p1409_p12, %p1403_p0 }
  0x29   : > { %1413 = shalt.err (!%p1410_p11)
}
  0x2a   : > { %s1601_s16 = smov [#allocation2]   ;;  %s1109_s17 = sshll.u32 %s1599_s21, 7 }
  0x2b   : > { %1207 = dma.vmem_to_smem (!%p1721_p7), %s199_s10, 16, %s1601_s16, [#allocation5]  }
  0x2c   : > { %s213_s25 = scalar_lea.vmem [#allocation6], %s1108_s14  ;;  %s2392_s1 = sld [smem:[#allocation21_spill]] }
  0x2d   : > { %s219_s26 = sshll.u32 %s213_s25, 4  ;;  %s210_s11 = scalar_lea.sflag [#allocation3], %s1726_s12  ;;  %s1747_s26 = int_to_ptr.vmem [resolvable:$true] %s219_s26 }
  0x2e   : > { %p1416_p5 = pneg %p1730_p3 }
  0x32   : > { %s1745_s9 = scalar_lea.hbm %s2392_s1, %s1109_s17  ;;  %s1419_s16 = scalar_lea.hbm %s2392_s1, 8192 }
  0x33   : > { %s1414_s15 = scalar_lea.hbm %s1745_s9, 4096  ;;  %p1420_p0 = scmp.lt.s32.totalorder %s1745_s9, %s2392_s1 }
  0x34   : > { %p1415_p4 = scmp.ne.s32.totalorder %s1745_s9, %s1414_s15  ;;  %p1421_p2 = scmp.lt.s32.totalorder %s1419_s16, %s1414_s15 }
  0x36   : > { %p1417_p11 = pnand %p1416_p5, %p1415_p4  ;;  %p1422_p7 = por %p1421_p2, %p1420_p0 }
  0x38   : > { %p1418_p12 = pneg %p1417_p11 }
  0x3a   : > { %p1423_p8 = pnand %p1422_p7, %p1418_p12 }
  0x3c   : > { %1426 = shalt.err (!%p1423_p8)
}
  0x3d   : > { %s1427_s8 = scalar_lea.vmem %s1747_s26, 4096  ;;  %s1602_s10 = smov [#allocation6]  }
  0x3e   : > { %p1428_p9 = scmp.ne.s32.totalorder %s1747_s26, %s1427_s8  ;;  %s1432_s14 = sshll.u32 %s1602_s10, 4  ;;  %s1433_s14 = int_to_ptr.vmem [resolvable:$false] %s1432_s14 }
  0x3f   : > { %s1434_s23 = scalar_lea.vmem %s1433_s14, 8192  ;;  %p1435_p4 = scmp.lt.s32.totalorder %s1747_s26, %s1433_s14 }
  0x40   : > { %p1430_p10 = pnand %p1428_p9, %p1416_p5  ;;  %p1436_p11 = scmp.lt.s32.totalorder %s1434_s23, %s1427_s8 }
  0x42   : > { %p1431_p1 = pneg %p1430_p10  ;;  %p1437_p6 = por %p1436_p11, %p1435_p4 }
  0x44   : > { %p1438_p0 = pnand %p1437_p6, %p1431_p1 }
  0x46   : > { %1441 = shalt.err (!%p1438_p0)
}
  0x47   : > { %s1603_s15 = smov 256   ;;  %s1604_s16 = smov 128  }
  0x48   : > { %s1605_s25 = smov 8   ;;  %s1110_s23 = sshll.u32 %s1726_s12, 7 }
  0x49   : > { %1211 = dma.hbm_to_vmem [thread:$0]  (!%p1730_p3), %s1745_s9, 4096, %s1747_s26, %s210_s11, %s1603_s15, %s1604_s16, %s1605_s25  }
  0x4a   : > { %s997_s10 = scalar_lea.hbm %s2371_s2, %s1109_s17  ;;  %s233_s0 = scalar_lea.vmem [#allocation7], %s1110_s23 }
  0x4b   : > { %s1785_s14 = scalar_lea.hbm %s997_s10, 8192  ;;  %s240_s1 = sshll.u32 %s233_s0, 4  ;;  %s1787_s1 = int_to_ptr.vmem [resolvable:$true] %s240_s1 }
  0x4c   : > { %s230_s27 = scalar_lea.sflag [#allocation8], %s1726_s12  ;;  %s1470_s20 = scalar_lea.hbm %s997_s10, 10240 }
  0x4d   : > { %p1443_p6 = scmp.ne.s32.totalorder %s1785_s14, %s1470_s20  ;;  %s1447_s11 = scalar_lea.hbm %s2371_s2, 14336 }
  0x4e   : > { %p1448_p7 = scmp.lt.s32.totalorder %s1785_s14, %s2371_s2  ;;  %p1449_p8 = scmp.lt.s32.totalorder %s1447_s11, %s1470_s20 }
  0x4f   : > { %p1445_p12 = pnand %p1443_p6, %p1416_p5 }
  0x50   : > { %p1450_p9 = por %p1449_p8, %p1448_p7 }
  0x51   : > { %p1446_p2 = pneg %p1445_p12 }
  0x53   : > { %p1451_p10 = pnand %p1450_p9, %p1446_p2 }
  0x55   : > { %1454 = shalt.err (!%p1451_p10)
}
  0x56   : > { %s1455_s0 = scalar_lea.vmem %s1787_s1, 2048  ;;  %s1606_s12 = smov [#allocation7]  }
  0x57   : > { %p1456_p1 = scmp.ne.s32.totalorder %s1787_s1, %s1455_s0  ;;  %s1460_s23 = sshll.u32 %s1606_s12, 4  ;;  %s1461_s23 = int_to_ptr.vmem [resolvable:$false] %s1460_s23 }
  0x58   : > { %s1462_s8 = scalar_lea.vmem %s1461_s23, 4096  ;;  %p1463_p0 = scmp.lt.s32.totalorder %s1787_s1, %s1461_s23 }
  0x59   : > { %p1458_p4 = pnand %p1456_p1, %p1416_p5  ;;  %p1464_p6 = scmp.lt.s32.totalorder %s1462_s8, %s1455_s0 }
  0x5b   : > { %p1459_p11 = pneg %p1458_p4  ;;  %p1465_p12 = por %p1464_p6, %p1463_p0 }
  0x5d   : > { %p1466_p7 = pnand %p1465_p12, %p1459_p11 }
  0x5f   : > { %1469 = shalt.err (!%p1466_p7)
}
  0x60   : > { %1214 = dma.hbm_to_vmem [thread:$0]  (!%p1730_p3), %s1785_s14, 2048, %s1787_s1, %s230_s27, %s1603_s15, %s1604_s16, %s1605_s25  }
  0x61   : > { %252 = sbr.rel (%p1708_p13) target bundleno = 290 (0x122), region = 32  ;;  %p2393_p5 = scmp.eq.s32.totalorder (!%p1708_p13), %s1667_s22, 0 }
  0x66   : > { %1566 = dma.done.wait (%p2393_p5), [#allocation5], 16   ;;  %p2394_p2 = pmov %p2393_p5 }
  0x67   : > { %s1821_s20 = sand.u32 1, %s1591_s19   ;;  %p2395_p3 = scmp.ne.s32.totalorder %s2385_s29, 0 }
  0x68   : > { %1568 = vsyncadd (%p2394_p2), [#allocation5], 4294967280  ;;  %s1114_s13 = sshll.u32 %s1821_s20, 8  ;;  %s259_s10 = scalar_lea.sflag [#allocation3], %s1821_s20 }
  0x69   : > { %s1825_s26 = scalar_lea.vmem [#allocation6], %s1114_s13 }
  0x6a   : > { %1570 = dma.done.wait (%p2395_p3), %s259_s10, 4096  }
  0x6b   : > { %1572 = vsyncadd (%p2395_p3), %s259_s10, 4294963200  ;;  %s1115_s1 = sshll.u32 %s1821_s20, 7  ;;  %s268_s27 = scalar_lea.sflag [#allocation8], %s1821_s20 }
  0x6c   : > { %s1835_s7 = scalar_lea.vmem [#allocation7], %s1115_s1 }
  0x6d   : > { %1574 = dma.done.wait (%p2395_p3), %s268_s27, 2048  }
  0x6e   : > { %1576 = vsyncadd (%p2395_p3), %s268_s27, 4294965248 }
  0x6f   : > { %276 = sfence }
  0x70   : > { %s314_s15 = sld [smem:[#allocation2]]  ;;  %v315_v0 = vld [vmem:[%s1825_s26] sm:$0xff]  ;;  %v316_v1 = vld [vmem:[%s1825_s26 + $0x8] sm:$0xff]  ;;  %v317_v2 = vld [vmem:[%s1825_s26 + $0x10] sm:$0xff]  ;;  %vm322_vm0 = vcmask 130048   ;;  %vm349_vm1 = vcmask 125952  }
  0x71   : > { %s1119_s16 = sld [smem:[#allocation2 + $0x1]]  ;;  %v1118_v3 = vld [vmem:[%s1825_s26 + $0x18] sm:$0xff]  ;;  %v1120_v5 = vld [vmem:[%s1825_s26 + $0x20] sm:$0xff]  ;;  %v1121_v10 = vld [vmem:[%s1825_s26 + $0x28] sm:$0xff]  ;;  %s1189_s28 = smul.u32 96, %s1821_s20 }
  0x72   : > { %s1127_s25 = sld [smem:[#allocation2 + $0x2]]  ;;  %v1122_v11 = vld [vmem:[%s1825_s26 + $0x30] sm:$0xff]  ;;  %v1126_v12 = vld [vmem:[%s1825_s26 + $0x38] sm:$0xff]  ;;  %v1128_v14 = vld [vmem:[%s1825_s26 + $0x40] sm:$0xff]  ;;  %s2141_s12 = scalar_lea.vmem [#allocation12], %s1115_s1 }
  0x73   : > { %v1129_v15 = vld [vmem:[%s1825_s26 + $0x48] sm:$0xff]  ;;  %s1856_s29 = sld [smem:[#allocation2 + $0x3]]  ;;  %v1130_v25 = vld [vmem:[%s1825_s26 + $0x50] sm:$0xff]  ;;  %v1136_v52 = vld [vmem:[%s1825_s26 + $0x60] sm:$0xff]  ;;  %s2021_s0 = scalar_lea.vmem [#allocation10], %s1189_s28 }
  0x74   : > { %s1859_s14 = sld [smem:[#allocation2 + $0x4]]  ;;  %v1137_v54 = vld [vmem:[%s1825_s26 + $0x68] sm:$0xff]  ;;  %v1138_v55 = vld [vmem:[%s1825_s26 + $0x70] sm:$0xff]  ;;  %s886_s23 = sand.u32 1, %s1667_s22  }
  0x75   : > { %s1876_s9 = sld [smem:[#allocation2 + $0x5]]  ;;  %s1185_s8 = sshll.u32 %s1667_s22, 6 }
  0x76   : > { %v318_v4 = vstv %s314_s15  ;;  %s1881_s11 = sld [smem:[#allocation2 + $0x6]]  ;;  %s919_s13 = sshll.u32 %s2021_s0, 4  ;;  %s2180_s13 = int_to_ptr.vmem [resolvable:$true] %s919_s13 }
  0x77   : > { %v319_v6 = vmul.f32 %v318_v4, %v315_v0  ;;  %v320_v7 = vmul.f32 %v318_v4, %v316_v1  ;;  %v321_v8 = vmul.f32 %v318_v4, %v317_v2  ;;  %v355_v9 = vmul.f32 %v1118_v3, %v318_v4  ;;  %v1144_v0 = vld [vmem:[%s1825_s26 + $0x80] sm:$0xff]  ;;  %v1145_v4 = vld [vmem:[%s1825_s26 + $0x88] sm:$0xff]  ;;  %s1935_s17 = sld [smem:[#allocation2 + $0x7]]  ;;  %s2178_s1 = scalar_lea.hbm %s2373_s4, %s1185_s8 }
  0x78   : > { %v367_v13 = vstv %s1119_s16  ;;  %v1851_v16 = vstv %s1127_s25  ;;  %s2200_s27 = scalar_lea.sflag [#allocation11], %s886_s23  ;;  %p2396_p8 = scmp.ne.s32.totalorder %s2386_s30, 0 }
  0x79   : > { %v323_v17 = vsel %vm322_vm0, %v319_v6, -inf  ;;  %v324_v18 = vsel %vm322_vm0, %v320_v7, -inf  ;;  %v325_v19 = vsel %vm322_vm0, %v321_v8, -inf  ;;  %v356_v20 = vsub.f32 0.0, %v355_v9  ;;  %s1607_s15 = smov [#allocation10]  }
  0x7a   : > { %v326_v21 = vmax.f32 %v323_v17, %v324_v18  ;;  %v368_v22 = vmul.f32 %v1120_v5, %v367_v13  ;;  %v369_v23 = vmul.f32 %v1121_v10, %v367_v13  ;;  %v370_v24 = vmul.f32 %v1122_v11, %v367_v13  ;;  %v1146_v5 = vld [vmem:[%s1825_s26 + $0x90] sm:$0xff]  ;;  %s1475_s16 = sshll.u32 %s1607_s15, 4  ;;  %s1476_s16 = int_to_ptr.vmem [resolvable:$false] %s1475_s16 }
  0x7b   : > { %v357_v26 = vmul.f32 1.442695, %v356_v20  ;;  %v403_v27 = vmul.f32 %v1126_v12, %v367_v13  ;;  %v416_v28 = vmul.f32 %v1128_v14, %v1851_v16  ;;  %v417_v29 = vmul.f32 %v1129_v15, %v1851_v16  ;;  %v1142_v13 = vld [vmem:[%s1825_s26 + $0x78] sm:$0xff]  ;;  %s1477_s25 = scalar_lea.vmem %s1476_s16, 3072  ;;  %p1478_p1 = scmp.lt.s32.totalorder %s2180_s13, %s1476_s16 }
  0x7c   : > { %v327_v30 = vmax.f32 %v326_v21, %v325_v19  ;;  %v371_v31 = vsel %vm322_vm0, %v368_v22, -inf  ;;  %v372_v32 = vsel %vm322_vm0, %v369_v23, -inf  ;;  %v373_v33 = vsel %vm322_vm0, %v370_v24, -inf }
  0x7d   : > { %1271 = vpow2.f32 %v357_v26  ;;  %v374_v34 = vmax.f32 %v371_v31, %v372_v32  ;;  %v404_v35 = vsub.f32 0.0, %v403_v27  ;;  %v418_v36 = vmul.f32 %v1130_v25, %v1851_v16  ;;  %v1152_v32 = vld [vmem:[%s1825_s26 + $0xa0] sm:$0xff] }
  0x7e   : > { %v328_v37 = vsub.f32 %v319_v6, %v327_v30  ;;  %v329_v38 = vsub.f32 %v320_v7, %v327_v30  ;;  %v330_v39 = vsub.f32 %v321_v8, %v327_v30  ;;  %v419_v40 = vsel %vm322_vm0, %v416_v28, -inf  ;;  %v1150_v6 = vld [vmem:[%s1825_s26 + $0x98] sm:$0xff] }
  0x7f   : > { %v375_v41 = vmax.f32 %v374_v34, %v373_v33  ;;  %v405_v42 = vmul.f32 1.442695, %v404_v35  ;;  %v420_v43 = vsel %vm322_vm0, %v417_v29, -inf  ;;  %v421_v44 = vsel %vm322_vm0, %v418_v36, -inf  ;;  %v1153_v33 = vld [vmem:[%s1825_s26 + $0xa8] sm:$0xff]  ;;  %v1154_v35 = vld [vmem:[%s1825_s26 + $0xb0] sm:$0xff] }
  0x80   : > { %v331_v45 = vmul.f32 1.442695, %v328_v37  ;;  %v333_v46 = vmul.f32 1.442695, %v329_v38  ;;  %v335_v47 = vmul.f32 1.442695, %v330_v39  ;;  %v422_v48 = vmax.f32 %v419_v40, %v420_v43 }
  0x81   : > { %v376_v49 = vsub.f32 %v368_v22, %v375_v41  ;;  %v377_v50 = vsub.f32 %v369_v23, %v375_v41  ;;  %v378_v51 = vsub.f32 %v370_v24, %v375_v41  ;;  %1273 = vpow2.f32 %v405_v42 }
  0x82   : > { %1275 = vpow2.f32 %v331_v45  ;;  %v423_v53 = vmax.f32 %v422_v48, %v421_v44  ;;  %v463_v56 = vstv %s1856_s29  ;;  %v511_v57 = vstv %s1859_s14 }
  0x83   : > { %1277 = vpow2.f32 %v333_v46  ;;  %v379_v58 = vmul.f32 1.442695, %v376_v49  ;;  %v381_v59 = vmul.f32 1.442695, %v377_v50  ;;  %v383_v60 = vmul.f32 1.442695, %v378_v51 }
  0x84   : > { %1279 = vpow2.f32 %v335_v47  ;;  %v424_v61 = vsub.f32 %v416_v28, %v423_v53  ;;  %v425_v62 = vsub.f32 %v417_v29, %v423_v53  ;;  %v426_v63 = vsub.f32 %v418_v36, %v423_v53 }
  0x85   : > { %1281 = vpow2.f32 %v379_v58  ;;  %v464_v1 = vmul.f32 %v1136_v52, %v463_v56  ;;  %v465_v2 = vmul.f32 %v1137_v54, %v463_v56  ;;  %v466_v3 = vmul.f32 %v1138_v55, %v463_v56 }
  0x86   : > { %1283 = vpow2.f32 %v381_v59  ;;  %v427_v7 = vmul.f32 1.442695, %v424_v61  ;;  %v429_v8 = vmul.f32 1.442695, %v425_v62  ;;  %v431_v9 = vmul.f32 1.442695, %v426_v63 }
  0x87   : > { %1285 = vpow2.f32 %v383_v60  ;;  %v467_v10 = vsel %vm322_vm0, %v464_v1, -inf  ;;  %v468_v11 = vsel %vm322_vm0, %v465_v2, -inf  ;;  %v469_v12 = vsel %vm322_vm0, %v466_v3, -inf }
  0x88   : > { %1287 = vpow2.f32 %v427_v7  ;;  %v470_v14 = vmax.f32 %v467_v10, %v468_v11  ;;  %v512_v15 = vmul.f32 %v1144_v0, %v511_v57  ;;  %v513_v17 = vmul.f32 %v1145_v4, %v511_v57 }
  0x89   : > { %1289 = vpow2.f32 %v429_v8  ;;  %v514_v18 = vmul.f32 %v1146_v5, %v511_v57  ;;  %v547_v19 = vmul.f32 %v1150_v6, %v511_v57  ;;  %v1887_v22 = vmul.f32 %v1142_v13, %v463_v56  ;;  %v1160_v8 = vld [vmem:[%s1825_s26 + $0xc0] sm:$0xff]  ;;  %v1161_v13 = vld [vmem:[%s1825_s26 + $0xc8] sm:$0xff] }
  0x8a   : > { %v1272_v20 = vpop.eup %1271  ;;  %1291 = vpow2.f32 %v431_v9  ;;  %v471_v21 = vmax.f32 %v470_v14, %v469_v12  ;;  %v515_v23 = vsel %vm322_vm0, %v512_v15, -inf  ;;  %v516_v25 = vsel %vm322_vm0, %v513_v17, -inf  ;;  %v1162_v14 = vld [vmem:[%s1825_s26 + $0xd0] sm:$0xff] }
  0x8b   : > { %v359_v24 = vadd.f32 1.0, %v1272_v20  ;;  %v517_v26 = vsel %vm322_vm0, %v514_v18, -inf  ;;  %v548_v27 = vsub.f32 0.0, %v547_v19  ;;  %v518_v31 = vmax.f32 %v515_v23, %v516_v25 }
  0x8c   : > { %v472_v28 = vsub.f32 %v464_v1, %v471_v21  ;;  %v473_v29 = vsub.f32 %v465_v2, %v471_v21  ;;  %v474_v30 = vsub.f32 %v466_v3, %v471_v21  ;;  %v559_v36 = vstv %s1876_s9  ;;  %v1158_v3 = vld [vmem:[%s1825_s26 + $0xb8] sm:$0xff] }
  0x8d   : > { %1293 = vrcp.f32 %v359_v24  ;;  %v549_v34 = vmul.f32 1.442695, %v548_v27  ;;  %v1897_v37 = vstv %s1881_s11  ;;  %v519_v42 = vmax.f32 %v518_v31, %v517_v26 }
  0x8e   : > { %v1274_v38 = vpop.eup %1273  ;;  %v475_v39 = vmul.f32 1.442695, %v472_v28  ;;  %v477_v40 = vmul.f32 1.442695, %v473_v29  ;;  %v479_v41 = vmul.f32 1.442695, %v474_v30  ;;  %v1901_v45 = vmul.f32 %v1152_v32, %v559_v36 }
  0x8f   : > { %v1899_v43 = vpop.eup %1275  ;;  %v407_v44 = vadd.f32 1.0, %v1274_v38  ;;  %1295 = vpow2.f32 %v549_v34  ;;  %v1903_v46 = vmul.f32 %v1153_v33, %v559_v36  ;;  %v520_v49 = vsub.f32 %v512_v15, %v519_v42  ;;  %v1166_v33 = vld [vmem:[%s1825_s26 + $0xd8] sm:$0xff]  ;;  %v1168_v34 = vld [vmem:[%s1825_s26 + $0xe0] sm:$0xff] }
  0x90   : > { %v1905_v47 = vpop.eup %1277  ;;  %v337_v48 = vsel %vm322_vm0, %v1899_v43, 0.0  ;;  %1297 = vpow2.f32 %v475_v39  ;;  %v521_v50 = vsub.f32 %v513_v17, %v519_v42  ;;  %v522_v53 = vsub.f32 %v514_v18, %v519_v42 }
  0x91   : > { %v1909_v51 = vpop.eup %1279  ;;  %v338_v52 = vsel %vm322_vm0, %v1905_v47, 0.0  ;;  %1299 = vrcp.f32 %v407_v44  ;;  %v562_v54 = vmul.f32 %v1154_v35, %v559_v36  ;;  %v523_v58 = vmul.f32 1.442695, %v520_v49  ;;  %v1169_v35 = vld [vmem:[%s1825_s26 + $0xe8] sm:$0xff] }
  0x92   : > { %v1913_v55 = vpop.eup %1281  ;;  %v339_v56 = vadd.f32 %v338_v52, %v337_v48  ;;  %v340_v57 = vsel %vm322_vm0, %v1909_v51, 0.0  ;;  %1301 = vpow2.f32 %v477_v40  ;;  %v525_v61 = vmul.f32 1.442695, %v521_v50 }
  0x93   : > { %v1917_v59 = vpop.eup %1283  ;;  %v385_v60 = vsel %vm322_vm0, %v1913_v55, 0.0  ;;  %1303 = vpow2.f32 %v479_v41  ;;  %v527_v62 = vmul.f32 1.442695, %v522_v53  ;;  %v563_v2 = vsel %vm322_vm0, %v1901_v45, -inf  ;;  %v1170_v41 = vld [vmem:[%s1825_s26 + $0xf0] sm:$0xff] }
  0x94   : > { %v1921_v63 = vpop.eup %1285  ;;  %v341_v0 = vadd.f32 %v340_v57, %v339_v56  ;;  %v386_v1 = vsel %vm322_vm0, %v1917_v59, 0.0  ;;  %1305 = vpow2.f32 %v523_v58  ;;  %v564_v7 = vsel %vm322_vm0, %v1903_v46, -inf }
  0x95   : > { %v1928_v4 = vpop.eup %1287  ;;  %v387_v5 = vadd.f32 %v386_v1, %v385_v60  ;;  %v388_v6 = vsel %vm322_vm0, %v1921_v63, 0.0  ;;  %1307 = vpow2.f32 %v525_v61  ;;  %v565_v11 = vsel %vm322_vm0, %v562_v54, -inf }
  0x96   : > { %v1937_v9 = vpop.eup %1289  ;;  %1309 = vrcp.f32 %v341_v0  ;;  %v433_v10 = vsel %vm322_vm0, %v1928_v4, 0.0  ;;  %v566_v12 = vmax.f32 %v563_v2, %v564_v7  ;;  %v595_v19 = vmul.f32 %v1158_v3, %v559_v36 }
  0x97   : > { %v1944_v15 = vpop.eup %1291  ;;  %v389_v17 = vadd.f32 %v388_v6, %v387_v5  ;;  %v434_v18 = vsel %vm322_vm0, %v1937_v9, 0.0  ;;  %1311 = vpow2.f32 %v527_v62  ;;  %v608_v24 = vmul.f32 %v1160_v8, %v1897_v37 }
  0x98   : > { %v435_v20 = vadd.f32 %v434_v18, %v433_v10  ;;  %v436_v21 = vsel %vm322_vm0, %v1944_v15, 0.0  ;;  %v567_v23 = vmax.f32 %v566_v12, %v565_v11  ;;  %v596_v25 = vsub.f32 0.0, %v595_v19 }
  0x99   : > { %1313 = vrcp.f32 %v389_v17  ;;  %v609_v26 = vmul.f32 %v1161_v13, %v1897_v37  ;;  %v1953_v27 = vmul.f32 %v1162_v14, %v1897_v37  ;;  %v611_v38 = vsel %vm322_vm0, %v608_v24, -inf }
  0x9a   : > { %v1955_v28 = vpop.eup %1293  ;;  %v437_v29 = vadd.f32 %v436_v21, %v435_v20  ;;  %v568_v30 = vsub.f32 %v1901_v45, %v567_v23  ;;  %v569_v31 = vsub.f32 %v1903_v46, %v567_v23  ;;  %v570_v32 = vsub.f32 %v562_v54, %v567_v23 }
  0x9b   : > { %v597_v36 = vmul.f32 1.442695, %v596_v25  ;;  %v612_v39 = vsel %vm322_vm0, %v609_v26, -inf  ;;  %v613_v40 = vsel %vm322_vm0, %v1953_v27, -inf  ;;  %v643_v50 = vmul.f32 %v1166_v33, %v1897_v37  ;;  %v1134_v33 = vld [vmem:[%s1825_s26 + $0x58] sm:$0xff] }
  0x9c   : > { %v1967_v42 = vpop.eup %1295  ;;  %1315 = vrcp.f32 %v437_v29  ;;  %v571_v44 = vmul.f32 1.442695, %v568_v30  ;;  %v573_v45 = vmul.f32 1.442695, %v569_v31  ;;  %v575_v46 = vmul.f32 1.442695, %v570_v32 }
  0x9d   : > { %v1969_v48 = vpop.eup %1297  ;;  %1317 = vpow2.f32 %v597_v36  ;;  %v614_v49 = vmax.f32 %v611_v38, %v612_v39  ;;  %v655_v52 = vstv %s1935_s17  ;;  %v644_v61 = vsub.f32 0.0, %v643_v50  ;;  %v1174_v32 = vld [vmem:[%s1825_s26 + $0xf8] sm:$0xff] }
  0x9e   : > { %v1973_v53 = vpop.eup %1299  ;;  %v481_v54 = vsel %vm322_vm0, %v1969_v48, 0.0  ;;  %1319 = vpow2.f32 %v571_v44  ;;  %v1977_v56 = vmul.f32 %v1168_v34, %v655_v52  ;;  %v1979_v57 = vmul.f32 %v1169_v35, %v655_v52 }
  0x9f   : > { %v1981_v58 = vpop.eup %1301  ;;  %1321 = vpow2.f32 %v573_v45  ;;  %v615_v60 = vmax.f32 %v614_v49, %v613_v40  ;;  %v1983_v62 = vmul.f32 %v1170_v41, %v655_v52  ;;  %v645_v13 = vmul.f32 1.442695, %v644_v61 }
  0xa0   : > { %v1985_v37 = vpop.eup %1303  ;;  %v482_v0 = vsel %vm322_vm0, %v1981_v58, 0.0  ;;  %1323 = vpow2.f32 %v575_v46  ;;  %v659_v1 = vsel %vm322_vm0, %v1977_v56, -inf  ;;  %v660_v2 = vsel %vm322_vm0, %v1979_v57, -inf }
  0xa1   : > { %v1993_v3 = vpop.eup %1305  ;;  %v483_v5 = vadd.f32 %v482_v0, %v481_v54  ;;  %v484_v6 = vsel %vm322_vm0, %v1985_v37, 0.0  ;;  %v616_v7 = vsub.f32 %v608_v24, %v615_v60  ;;  %v617_v8 = vsub.f32 %v609_v26, %v615_v60 }
  0xa2   : > { %v1998_v10 = vpop.eup %1307  ;;  %v529_v11 = vsel %vm322_vm0, %v1993_v3, 0.0  ;;  %v618_v12 = vsub.f32 %v1953_v27, %v615_v60  ;;  %v661_v14 = vsel %vm322_vm0, %v1983_v62, -inf  ;;  %v662_v31 = vmax.f32 %v659_v1, %v660_v2 }
  0xa3   : > { %v1310_v17 = vpop.eup %1309  ;;  %v485_v18 = vadd.f32 %v484_v6, %v483_v5  ;;  %v530_v19 = vsel %vm322_vm0, %v1998_v10, 0.0  ;;  %v619_v20 = vmul.f32 1.442695, %v616_v7  ;;  %v621_v21 = vmul.f32 1.442695, %v617_v8 }
  0xa4   : > { %v2007_v23 = vpop.eup %1311  ;;  %v343_v24 = vmul.f32 %v1310_v17, %v1899_v43  ;;  %v344_v25 = vmul.f32 %v1310_v17, %v1905_v47  ;;  %v345_v26 = vmul.f32 %v1310_v17, %v1909_v51  ;;  %v531_v27 = vadd.f32 %v530_v19, %v529_v11  ;;  %v801_v17 = vld [vmem:[%s1835_s7] sm:$0xff] }
  0xa5   : > { %1325 = vrcp.f32 %v485_v18  ;;  %v532_v29 = vsel %vm322_vm0, %v2007_v23, 0.0  ;;  %v623_v30 = vmul.f32 1.442695, %v618_v12 }
  0xa6   : > { %v1314_v34 = vpop.eup %1313  ;;  %v346_v35 = vpack.c.bf16 %v343_v24, %v343_v24  ;;  %v347_v36 = vpack.c.bf16 %v344_v25, %v344_v25  ;;  %v348_v38 = vpack.c.bf16 %v345_v26, %v345_v26  ;;  %v533_v39 = vadd.f32 %v532_v29, %v531_v27 }
  0xa7   : > { %v391_v43 = vmul.f32 %v1314_v34, %v1913_v55  ;;  %v392_v47 = vmul.f32 %v1314_v34, %v1917_v59  ;;  %v393_v51 = vmul.f32 %v1314_v34, %v1921_v63  ;;  %1327 = vpow2.f32 %v619_v20 }
  0xa8   : > { %350 = vst.msk [vmem:[%s2021_s0] sm:$0xf] %vm349_vm1, %v346_v35  ;;  %351 = vst.msk [vmem:[%s2021_s0 + $0x4] sm:$0xf] %vm349_vm1, %v347_v36  ;;  %1329 = vrcp.f32 %v533_v39  ;;  %v663_v55 = vmax.f32 %v662_v31, %v661_v14  ;;  %v691_v59 = vmul.f32 %v1174_v32, %v655_v52  ;;  %v451_v63 = vmul.f32 %v1134_v33, %v1851_v16  ;;  %v802_v35 = vld [vmem:[%s1835_s7 + $0x8] sm:$0xff] }
  0xa9   : > { %352 = vst.msk [vmem:[%s2021_s0 + $0x8] sm:$0xf] %vm349_vm1, %v348_v38  ;;  %v1316_v40 = vpop.eup %1315  ;;  %v394_v41 = vpack.c.bf16 %v391_v43, %v391_v43  ;;  %v395_v44 = vpack.c.bf16 %v392_v47, %v392_v47  ;;  %v396_v45 = vpack.c.bf16 %v393_v51, %v393_v51  ;;  %1331 = vpow2.f32 %v621_v21  ;;  %v804_v51 = vld [vmem:[%s1835_s7 + $0x18] sm:$0xff] }
  0xaa   : > { %v1318_v46 = vpop.eup %1317  ;;  %v439_v49 = vmul.f32 %v1316_v40, %v1928_v4  ;;  %v440_v50 = vmul.f32 %v1316_v40, %v1937_v9  ;;  %v441_v54 = vmul.f32 %v1316_v40, %v1944_v15  ;;  %1333 = vpow2.f32 %v623_v30  ;;  %v805_v40 = vld [vmem:[%s1835_s7 + $0x20] sm:$0xff] }
  0xab   : > { %v2033_v60 = vpop.eup %1319  ;;  %1123 = vst.msk [vmem:[%s2021_s0 + $0xc] sm:$0xf] %vm349_vm1, %v394_v41  ;;  %1124 = vst.msk [vmem:[%s2021_s0 + $0x10] sm:$0xf] %vm349_vm1, %v395_v44  ;;  %v500_v16 = vsub.f32 0.0, %v1887_v22  ;;  %1335 = vpow2.f32 %v645_v13  ;;  %v664_v4 = vsub.f32 %v1977_v56, %v663_v55  ;;  %v665_v9 = vsub.f32 %v1979_v57, %v663_v55 }
  0xac   : > { %1125 = vst.msk [vmem:[%s2021_s0 + $0x14] sm:$0xf] %vm349_vm1, %v396_v45  ;;  %v2044_v15 = vpop.eup %1321  ;;  %v442_v52 = vpack.c.bf16 %v439_v49, %v439_v49  ;;  %v443_v61 = vpack.c.bf16 %v440_v50, %v440_v50  ;;  %v444_v0 = vpack.c.bf16 %v441_v54, %v441_v54  ;;  %v577_v1 = vsel %vm322_vm0, %v2033_v60, 0.0  ;;  %v806_v45 = vld [vmem:[%s1835_s7 + $0x28] sm:$0xff] }
  0xad   : > { %v2048_v2 = vpop.eup %1323  ;;  %v578_v5 = vsel %vm322_vm0, %v2044_v15, 0.0  ;;  %v666_v22 = vsub.f32 %v1983_v62, %v663_v55  ;;  %v667_v6 = vmul.f32 1.442695, %v664_v4  ;;  %v669_v56 = vmul.f32 1.442695, %v665_v9 }
  0xae   : > { %1131 = vst.msk [vmem:[%s2021_s0 + $0x18] sm:$0xf] %vm349_vm1, %v442_v52  ;;  %1132 = vst.msk [vmem:[%s2021_s0 + $0x1c] sm:$0xf] %vm349_vm1, %v443_v61  ;;  %v579_v57 = vadd.f32 %v578_v5, %v577_v1  ;;  %v580_v7 = vsel %vm322_vm0, %v2048_v2, 0.0  ;;  %v692_v8 = vsub.f32 0.0, %v691_v59 }
  0xaf   : > { %1133 = vst.msk [vmem:[%s2021_s0 + $0x20] sm:$0xf] %vm349_vm1, %v444_v0  ;;  %v452_v11 = vsub.f32 0.0, %v451_v63  ;;  %1337 = vpow2.f32 %v667_v6  ;;  %v671_v12 = vmul.f32 1.442695, %v666_v22  ;;  %v551_v20 = vadd.f32 1.0, %v1967_v42 }
  0xb0   : > { %v581_v13 = vadd.f32 %v580_v7, %v579_v57  ;;  %1339 = vpow2.f32 %v669_v56  ;;  %v693_v62 = vmul.f32 1.442695, %v692_v8  ;;  %v501_v19 = vmul.f32 1.442695, %v500_v16  ;;  %v807_v57 = vld [vmem:[%s1835_s7 + $0x30] sm:$0xff] }
  0xb1   : > { %v453_v14 = vmul.f32 1.442695, %v452_v11  ;;  %1341 = vpow2.f32 %v671_v12  ;;  %v599_v27 = vadd.f32 1.0, %v1318_v46  ;;  %v817_v29 = vmul.f32 1.442695, %v801_v17  ;;  %v808_v12 = vld [vmem:[%s1835_s7 + $0x38] sm:$0xff] }
  0xb2   : > { %v1326_v18 = vpop.eup %1325  ;;  %1343 = vrcp.f32 %v581_v13  ;;  %v819_v63 = vmul.f32 1.442695, %v802_v35  ;;  %v823_v46 = vmul.f32 1.442695, %v804_v51  ;;  %v825_v50 = vmul.f32 1.442695, %v805_v40 }
  0xb3   : > { %v487_v21 = vmul.f32 %v1326_v18, %v1969_v48  ;;  %v488_v24 = vmul.f32 %v1326_v18, %v1981_v58  ;;  %v489_v25 = vmul.f32 %v1326_v18, %v1985_v37  ;;  %1345 = vpow2.f32 %v693_v62  ;;  %v809_v17 = vld [vmem:[%s1835_s7 + $0x40] sm:$0xff]  ;;  %v810_v18 = vld [vmem:[%s1835_s7 + $0x48] sm:$0xff]  ;;  %v815_v35 = vld [vmem:[%s1835_s7 + $0x70] sm:$0xff] }
  0xb4   : > { %v2066_v26 = vpop.eup %1327  ;;  %1347 = vpow2.f32 %v453_v14  ;;  %v827_v4 = vmul.f32 1.442695, %v806_v45 }
  0xb5   : > { %v1330_v30 = vpop.eup %1329  ;;  %v490_v31 = vpack.c.bf16 %v487_v21, %v487_v21  ;;  %v491_v42 = vpack.c.bf16 %v488_v24, %v488_v24  ;;  %v492_v32 = vpack.c.bf16 %v489_v25, %v489_v25  ;;  %v625_v48 = vsel %vm322_vm0, %v2066_v26, 0.0  ;;  %v811_v24 = vld [vmem:[%s1835_s7 + $0x50] sm:$0xff] }
  0xb6   : > { %v2070_v58 = vpop.eup %1331  ;;  %v535_v37 = vmul.f32 %v1330_v30, %v1993_v3  ;;  %v536_v33 = vmul.f32 %v1330_v30, %v1998_v10  ;;  %v537_v34 = vmul.f32 %v1330_v30, %v2007_v23  ;;  %1349 = vpow2.f32 %v501_v19  ;;  %v803_v10 = vld [vmem:[%s1835_s7 + $0x10] sm:$0xff]  ;;  %v812_v30 = vld [vmem:[%s1835_s7 + $0x58] sm:$0xff] }
  0xb7   : > { %v2076_v36 = vpop.eup %1333  ;;  %1139 = vst.msk [vmem:[%s2021_s0 + $0x24] sm:$0xf] %vm349_vm1, %v490_v31  ;;  %1140 = vst.msk [vmem:[%s2021_s0 + $0x28] sm:$0xf] %vm349_vm1, %v491_v42  ;;  %v626_v3 = vsel %vm322_vm0, %v2070_v58, 0.0  ;;  %1351 = vrcp.f32 %v551_v20  ;;  %v813_v31 = vld [vmem:[%s1835_s7 + $0x60] sm:$0xff] }
  0xb8   : > { %1141 = vst.msk [vmem:[%s2021_s0 + $0x2c] sm:$0xf] %vm349_vm1, %v492_v32  ;;  %v1336_v23 = vpop.eup %1335  ;;  %v538_v38 = vpack.c.bf16 %v535_v37, %v535_v37  ;;  %v539_v39 = vpack.c.bf16 %v536_v33, %v536_v33  ;;  %v540_v43 = vpack.c.bf16 %v537_v34, %v537_v34  ;;  %v627_v47 = vadd.f32 %v626_v3, %v625_v48  ;;  %v814_v34 = vld [vmem:[%s1835_s7 + $0x68] sm:$0xff] }
  0xb9   : > { %v628_v55 = vsel %vm322_vm0, %v2076_v36, 0.0  ;;  %v647_v59 = vadd.f32 1.0, %v1336_v23  ;;  %1353 = vrcp.f32 %v599_v27  ;;  %v821_v44 = vmul.f32 1.442695, %v803_v10 }
  0xba   : > { %1147 = vst.msk [vmem:[%s2021_s0 + $0x30] sm:$0xf] %vm349_vm1, %v538_v38  ;;  %1148 = vst.msk [vmem:[%s2021_s0 + $0x34] sm:$0xf] %vm349_vm1, %v539_v39  ;;  %v629_v41 = vadd.f32 %v628_v55, %v627_v47  ;;  %1355 = vpow2.f32 %v817_v29  ;;  %v831_v21 = vmul.f32 1.442695, %v808_v12 }
  0xbb   : > { %1149 = vst.msk [vmem:[%s2021_s0 + $0x38] sm:$0xf] %vm349_vm1, %v540_v43  ;;  %1357 = vrcp.f32 %v647_v59  ;;  %v833_v25 = vmul.f32 1.442695, %v809_v17  ;;  %v835_v29 = vmul.f32 1.442695, %v810_v18 }
  0xbc   : > { %v2098_v49 = vpop.eup %1337  ;;  %1359 = vrcp.f32 %v629_v41  ;;  %v837_v32 = vmul.f32 1.442695, %v811_v24  ;;  %v698_v37 = vmul.f32 0.2, %v1955_v28  ;;  %v699_v10 = vmul.f32 0.3, %v1973_v53 }
  0xbd   : > { %v2100_v54 = vpop.eup %1339  ;;  %v673_v16 = vsel %vm322_vm0, %v2098_v49, 0.0  ;;  %1361 = vpow2.f32 %v819_v63  ;;  %v839_v23 = vmul.f32 1.442695, %v812_v30  ;;  %v841_v38 = vmul.f32 1.442695, %v813_v31  ;;  %v816_v55 = vld [vmem:[%s1835_s7 + $0x78] sm:$0xff] }
  0xbe   : > { %v2104_v9 = vpop.eup %1341  ;;  %v674_v52 = vsel %vm322_vm0, %v2100_v54, 0.0  ;;  %1363 = vpow2.f32 %v821_v44  ;;  %s1471_s7 = scalar_lea.vmem %s2180_s13, 1536 }
  0xbf   : > { %v1344_v61 = vpop.eup %1343  ;;  %v675_v0 = vadd.f32 %v674_v52, %v673_v16  ;;  %v676_v1 = vsel %vm322_vm0, %v2104_v9, 0.0  ;;  %1365 = vpow2.f32 %v823_v46  ;;  %v847_v16 = vmul.f32 1.442695, %v816_v55  ;;  %p1472_p13 = scmp.ne.s32.totalorder %s2180_s13, %s1471_s7  ;;  %p1479_p4 = scmp.lt.s32.totalorder %s1477_s25, %s1471_s7 }
  0xc0   : > { %v1346_v5 = vpop.eup %1345  ;;  %v583_v22 = vmul.f32 %v1344_v61, %v2033_v60  ;;  %v584_v6 = vmul.f32 %v1344_v61, %v2044_v15  ;;  %v585_v56 = vmul.f32 %v1344_v61, %v2048_v2  ;;  %1367 = vpow2.f32 %v825_v50 }
  0xc1   : > { %v1348_v7 = vpop.eup %1347  ;;  %v677_v8 = vadd.f32 %v676_v1, %v675_v0  ;;  %v695_v11 = vadd.f32 1.0, %v1346_v5  ;;  %1369 = vpow2.f32 %v827_v4  ;;  %v829_v2 = vmul.f32 1.442695, %v807_v57  ;;  %p1473_p9 = pnand %p1472_p13, %p2396_p8  ;;  %p1480_p11 = por %p1479_p4, %p1478_p1 }
  0xc2   : > { %v586_v13 = vpack.c.bf16 %v583_v22, %v583_v22  ;;  %v587_v62 = vpack.c.bf16 %v584_v6, %v584_v6  ;;  %v588_v14 = vpack.c.bf16 %v585_v56, %v585_v56  ;;  %v455_v60 = vadd.f32 1.0, %v1348_v7 }
  0xc3   : > { %v1350_v15 = vpop.eup %1349  ;;  %1371 = vrcp.f32 %v677_v8  ;;  %v700_v5 = vadd.f32 %v699_v10, %v698_v37  ;;  %p1474_p10 = pneg %p1473_p9 }
  0xc4   : > { %v2117_v19 = vpop.eup %1351  ;;  %1155 = vst.msk [vmem:[%s2021_s0 + $0x3c] sm:$0xf] %vm349_vm1, %v586_v13  ;;  %1156 = vst.msk [vmem:[%s2021_s0 + $0x40] sm:$0xf] %vm349_vm1, %v587_v62  ;;  %1373 = vrcp.f32 %v695_v11  ;;  %v503_v20 = vadd.f32 1.0, %v1350_v15 }
  0xc5   : > { %1157 = vst.msk [vmem:[%s2021_s0 + $0x44] sm:$0xf] %vm349_vm1, %v588_v14  ;;  %1375 = vrcp.f32 %v455_v60  ;;  %v703_v15 = vmul.f32 0.2, %v1973_v53  ;;  %p1481_p0 = pnand %p1480_p11, %p1474_p10 }
  0xc6   : > { %v2126_v27 = vpop.eup %1353  ;;  %1377 = vrcp.f32 %v503_v20 }
  0xc7   : > { %v1356_v42 = vpop.eup %1355  ;;  %1379 = vpow2.f32 %v829_v2  ;;  %v2172_v8 = vmul.f32 0.5, %v2126_v27 }
  0xc8   : > { %v2130_v48 = vpop.eup %1357  ;;  %v849_v33 = vmul.f32 10.0, %v1356_v42  ;;  %1381 = vpow2.f32 %v831_v21 }
  0xc9   : > { %v1360_v3 = vpop.eup %1359  ;;  %1383 = vpow2.f32 %v833_v25  ;;  %v729_v1 = vmul.f32 0.3, %v2130_v48  ;;  %v732_v21 = vmul.f32 0.2, %v2130_v48 }
  0xca   : > { %v1362_v39 = vpop.eup %1361  ;;  %v631_v43 = vmul.f32 %v1360_v3, %v2066_v26  ;;  %v632_v47 = vmul.f32 %v1360_v3, %v2070_v58  ;;  %v633_v51 = vmul.f32 %v1360_v3, %v2076_v36  ;;  %865 = vst.msk [vmem:[%s2141_s12] sm:$0xff] %vm322_vm0, %v849_v33  ;;  %1385 = vpow2.f32 %v835_v29 }
  0xcb   : > { %v1364_v59 = vpop.eup %1363  ;;  %v850_v63 = vmul.f32 10.0, %v1362_v39  ;;  %1387 = vpow2.f32 %v837_v32  ;;  %v843_v26 = vmul.f32 1.442695, %v814_v34  ;;  %v845_v58 = vmul.f32 1.442695, %v815_v35 }
  0xcc   : > { %v1366_v40 = vpop.eup %1365  ;;  %v634_v36 = vpack.c.bf16 %v631_v43, %v631_v43  ;;  %v635_v41 = vpack.c.bf16 %v632_v47, %v632_v47  ;;  %v636_v44 = vpack.c.bf16 %v633_v51, %v633_v51  ;;  %v851_v45 = vmul.f32 10.0, %v1364_v59 }
  0xcd   : > { %v1368_v46 = vpop.eup %1367  ;;  %866 = vst.msk [vmem:[%s2141_s12 + $0x8] sm:$0xff] %vm322_vm0, %v850_v63  ;;  %v852_v50 = vmul.f32 10.0, %v1366_v40  ;;  %1389 = vpow2.f32 %v839_v23 }
  0xce   : > { %v1370_v4 = vpop.eup %1369  ;;  %1163 = vst.msk [vmem:[%s2021_s0 + $0x48] sm:$0xf] %vm349_vm1, %v634_v36  ;;  %1164 = vst.msk [vmem:[%s2021_s0 + $0x4c] sm:$0xf] %vm349_vm1, %v635_v41  ;;  %v853_v52 = vmul.f32 10.0, %v1368_v46  ;;  %1391 = vpow2.f32 %v841_v38 }
  0xcf   : > { %1165 = vst.msk [vmem:[%s2021_s0 + $0x50] sm:$0xf] %vm349_vm1, %v636_v44  ;;  %v854_v61 = vmul.f32 10.0, %v1370_v4  ;;  %1393 = vpow2.f32 %v843_v26 }
  0xd0   : > { %867 = vst.msk [vmem:[%s2141_s12 + $0x10] sm:$0xff] %vm322_vm0, %v851_v45  ;;  %868 = vst.msk [vmem:[%s2141_s12 + $0x18] sm:$0xff] %vm322_vm0, %v852_v50  ;;  %v1372_v0 = vpop.eup %1371  ;;  %1395 = vpow2.f32 %v845_v58 }
  0xd1   : > { %869 = vst.msk [vmem:[%s2141_s12 + $0x20] sm:$0xff] %vm322_vm0, %v853_v52  ;;  %v2164_v22 = vpop.eup %1373  ;;  %v679_v6 = vmul.f32 %v1372_v0, %v2098_v49  ;;  %v680_v56 = vmul.f32 %v1372_v0, %v2100_v54  ;;  %v681_v57 = vmul.f32 %v1372_v0, %v2104_v9  ;;  %870 = vst.msk [vmem:[%s2141_s12 + $0x28] sm:$0xff] %vm322_vm0, %v854_v61  ;;  %1397 = vpow2.f32 %v847_v16 }
  0xd2   : > { %v1376_v7 = vpop.eup %1375  ;;  %v728_v11 = vmul.f32 0.2, %v2164_v22 }
  0xd3   : > { %v1378_v49 = vpop.eup %1377  ;;  %v682_v54 = vpack.c.bf16 %v679_v6, %v679_v6  ;;  %v683_v9 = vpack.c.bf16 %v680_v56, %v680_v56  ;;  %v684_v12 = vpack.c.bf16 %v681_v57, %v681_v57  ;;  %v2182_v13 = vmul.f32 0.5, %v1376_v7 }
  0xd4   : > { %v1380_v62 = vpop.eup %1379  ;;  %v730_v14 = vadd.f32 %v729_v1, %v728_v11 }
  0xd5   : > { %v1382_v60 = vpop.eup %1381  ;;  %1171 = vst.msk [vmem:[%s2021_s0 + $0x54] sm:$0xf] %vm349_vm1, %v682_v54  ;;  %1172 = vst.msk [vmem:[%s2021_s0 + $0x58] sm:$0xf] %vm349_vm1, %v683_v9  ;;  %v2191_v17 = vadd.f32 %v2182_v13, %v700_v5  ;;  %v855_v2 = vmul.f32 10.0, %v1380_v62 }
  0xd6   : > { %1173 = vst.msk [vmem:[%s2021_s0 + $0x5c] sm:$0xf] %vm349_vm1, %v684_v12  ;;  %v1384_v18 = vpop.eup %1383  ;;  %v2195_v20 = vadd.f32 %v730_v14, %v2172_v8  ;;  %v856_v24 = vmul.f32 10.0, %v1382_v60 }
  0xd7   : > { %1484 = shalt.err (!%p1481_p0)
}
  0xd8   : > { %s1485_s29 = scalar_lea.hbm %s2178_s1, 1536  ;;  %s1489_s11 = scalar_lea.hbm %s2373_s4, 3072 }
  0xd9   : > { %p1486_p6 = scmp.ne.s32.totalorder %s2178_s1, %s1485_s29  ;;  %p1490_p5 = scmp.lt.s32.totalorder %s2178_s1, %s2373_s4 }
  0xda   : > { %p1491_p2 = scmp.lt.s32.totalorder %s1489_s11, %s1485_s29 }
  0xdb   : > { %p1487_p12 = pnand %p1486_p6, %p2396_p8 }
  0xdc   : > { %p1492_p3 = por %p1491_p2, %p1490_p5 }
  0xdd   : > { %p1488_p7 = pneg %p1487_p12 }
  0xdf   : > { %p1493_p13 = pnand %p1492_p3, %p1488_p7 }
  0xe1   : > { %1496 = shalt.err (!%p1493_p13)
}
  0xe2   : > { %s1608_s0 = smov 64   ;;  %s1609_s23 = smov 128   ;;  %v1386_v25 = vpop.eup %1385  ;;  %v706_v27 = vmul.f32 0.5, %v1378_v49  ;;  %v704_v29 = vmul.f32 0.3, %v2191_v17  ;;  %871 = vst.msk [vmem:[%s2141_s12 + $0x30] sm:$0xff] %vm322_vm0, %v855_v2 }
  0xe3   : > { %s1610_s8 = smov 4   ;;  %v857_v30 = vmul.f32 10.0, %v1384_v18  ;;  %v1388_v31 = vpop.eup %1387  ;;  %v711_v42 = vmul.f32 0.5, %v2117_v19  ;;  %v733_v32 = vmul.f32 0.3, %v2195_v20  ;;  %872 = vst.msk [vmem:[%s2141_s12 + $0x38] sm:$0xff] %vm322_vm0, %v856_v24 }
  0xe4   : > { %1199 = dma.vmem_to_hbm [thread:$0]  (%p2396_p8), %s2180_s13, 1536, %s2178_s1, %s2200_s27, %s1608_s0, %s1609_s23, %s1610_s8   ;;  %v858_v37 = vmul.f32 10.0, %v1386_v25  ;;  %v705_v33 = vadd.f32 %v704_v29, %v703_v15  ;;  %v859_v34 = vmul.f32 10.0, %v1388_v31  ;;  %v1390_v35 = vpop.eup %1389  ;;  %v708_v19 = vmul.f32 0.2, %v2191_v17 }
  0xe5   : > { %873 = vst.msk [vmem:[%s2141_s12 + $0x40] sm:$0xff] %vm322_vm0, %v857_v30  ;;  %v734_v3 = vadd.f32 %v733_v32, %v732_v21  ;;  %v1392_v10 = vpop.eup %1391  ;;  %v860_v38 = vmul.f32 10.0, %v1390_v35  ;;  %s1184_s13 = sshll.u32 %s1667_s22, 7  ;;  %v736_v47 = vmul.f32 0.2, %v2195_v20  ;;  %s934_s10 = sshll.u32 %s2141_s12, 4  ;;  %s2254_s10 = int_to_ptr.vmem [resolvable:$true] %s934_s10 }
  0xe6   : > { %874 = vst.msk [vmem:[%s2141_s12 + $0x48] sm:$0xff] %vm322_vm0, %v858_v37  ;;  %v707_v23 = vadd.f32 %v706_v27, %v705_v33  ;;  %875 = vst.msk [vmem:[%s2141_s12 + $0x50] sm:$0xff] %vm322_vm0, %v859_v34  ;;  %v1394_v39 = vpop.eup %1393  ;;  %v861_v51 = vmul.f32 10.0, %v1392_v10  ;;  %s2250_s7 = scalar_lea.hbm %s2374_s5, %s1184_s13  ;;  %s1497_s15 = scalar_lea.vmem %s2254_s10, 2048 }
  0xe7   : > { %v735_v43 = vadd.f32 %v734_v3, %v711_v42  ;;  %v1396_v55 = vpop.eup %1395  ;;  %876 = vst.msk [vmem:[%s2141_s12 + $0x58] sm:$0xff] %vm322_vm0, %v860_v38  ;;  %v862_v63 = vmul.f32 10.0, %v1394_v39  ;;  %p1498_p9 = scmp.ne.s32.totalorder %s2254_s10, %s1497_s15  ;;  %s1611_s16 = smov [#allocation12]  }
  0xe8   : > { %v709_v59 = vmul.f32 0.3, %v707_v23  ;;  %v1398_v26 = vpop.eup %1397  ;;  %877 = vst.msk [vmem:[%s2141_s12 + $0x60] sm:$0xff] %vm322_vm0, %v861_v51  ;;  %v863_v40 = vmul.f32 10.0, %v1396_v55  ;;  %v713_v46 = vmul.f32 0.2, %v707_v23 }
  0xe9   : > { %v737_v58 = vmul.f32 0.3, %v735_v43  ;;  %878 = vst.msk [vmem:[%s2141_s12 + $0x68] sm:$0xff] %vm322_vm0, %v862_v63  ;;  %v864_v41 = vmul.f32 10.0, %v1398_v26  ;;  %v740_v16 = vmul.f32 0.2, %v735_v43  ;;  %p1499_p10 = pnand %p1498_p9, %p2396_p8 }
  0xea   : > { %v710_v36 = vadd.f32 %v709_v59, %v708_v19  ;;  %879 = vst.msk [vmem:[%s2141_s12 + $0x70] sm:$0xff] %vm322_vm0, %v863_v40  ;;  %s1501_s25 = sshll.u32 %s1611_s16, 4  ;;  %s1502_s25 = int_to_ptr.vmem [resolvable:$false] %s1501_s25 }
  0xeb   : > { %v738_v44 = vadd.f32 %v737_v58, %v736_v47  ;;  %880 = vst.msk [vmem:[%s2141_s12 + $0x78] sm:$0xff] %vm322_vm0, %v864_v41  ;;  %p1500_p1 = pneg %p1499_p10  ;;  %s1503_s29 = scalar_lea.vmem %s1502_s25, 4096 }
  0xec   : > { %v712_v45 = vadd.f32 %v711_v42, %v710_v36  ;;  %p1504_p4 = scmp.lt.s32.totalorder %s2254_s10, %s1502_s25  ;;  %p1505_p11 = scmp.lt.s32.totalorder %s1503_s29, %s1497_s15 }
  0xed   : > { %v739_v50 = vadd.f32 %v738_v44, %v706_v27 }
  0xee   : > { %p1506_p0 = por %p1505_p11, %p1504_p4 }
  0xf0   : > { %p1507_p6 = pnand %p1506_p0, %p1500_p1 }
  0xf2   : > { %1510 = shalt.err (!%p1507_p6)
}
  0xf3   : > { %s1511_s12 = scalar_lea.hbm %s2250_s7, 2048  ;;  %s1515_s11 = scalar_lea.hbm %s2374_s5, 4096 }
  0xf4   : > { %p1512_p12 = scmp.ne.s32.totalorder %s2250_s7, %s1511_s12  ;;  %p1516_p2 = scmp.lt.s32.totalorder %s2250_s7, %s2374_s5 }
  0xf5   : > { %p1517_p3 = scmp.lt.s32.totalorder %s1515_s11, %s1511_s12 }
  0xf6   : > { %p1513_p7 = pnand %p1512_p12, %p2396_p8 }
  0xf7   : > { %p1518_p13 = por %p1517_p3, %p1516_p2 }
  0xf8   : > { %p1514_p5 = pneg %p1513_p7 }
  0xfa   : > { %p1519_p9 = pnand %p1518_p13, %p1514_p5 }
  0xfc   : > { %1522 = shalt.err (!%p1519_p9)
}
  0xfd   : > { %s1612_s0 = smov 256   ;;  %s1613_s8 = smov 8   ;;  %v777_v4 = vadd.f32 %v735_v43, %v712_v45  ;;  %v714_v52 = vmul.f32 0.3, %v712_v45  ;;  %v741_v61 = vmul.f32 0.3, %v739_v50  ;;  %v771_v0 = vadd.f32 %v739_v50, %v707_v23 }
  0xfe   : > { %1200 = dma.vmem_to_hbm [thread:$0]  (%p2396_p8), %s2254_s10, 2048, %s2250_s7, %s2200_s27, %s1609_s23, %s1612_s0, %s1613_s8   ;;  %v718_v7 = vmul.f32 0.2, %v712_v45  ;;  %v744_v49 = vmul.f32 0.2, %v739_v50  ;;  %v1614_v54 = vmov 1.0  }
  0xff   : > { %s1116_s26 = sshll.u32 %s1821_s20, 6  ;;  %v778_v1 = vmul.f32 0.5, %v777_v4  ;;  %v715_v5 = vadd.f32 %v714_v52, %v713_v46  ;;  %v742_v6 = vadd.f32 %v741_v61, %v740_v16  ;;  %v772_v56 = vmul.f32 0.5, %v771_v0  ;;  %s2319_s15 = scalar_lea.hbm %s2372_s3, %s1184_s13 }
 0x100   : > { %s2287_s27 = scalar_lea.vmem [#allocation9], %s1116_s26  ;;  %v721_v60 = vmul.f32 0.5, %v2130_v48  ;;  %v726_v32 = vmul.f32 0.5, %v2164_v22  ;;  %v752_v33 = vmul.f32 0.5, %v1955_v28  ;;  %s882_s16 = scalar_lea.sflag [#allocation4], %s1821_s20 }
 0x101   : > { %vm779_vm2 = vcmp.lt.f32.partialorder %v778_v1, 0.12  ;;  %v717_v57 = vadd.f32 %v2172_v8, %v715_v5  ;;  %v743_v11 = vadd.f32 %v742_v6, %v2182_v13  ;;  %vm773_vm3 = vcmp.lt.f32.partialorder %v772_v56, 0.12  ;;  %s904_s10 = sshll.u32 %s2287_s27, 4  ;;  %s1615_s29 = smov [#allocation9]   ;;  %s2312_s10 = int_to_ptr.vmem [resolvable:$true] %s904_s10 }
 0x102   : > { %v780_v9 = vsel %vm779_vm2, 0.0, %v1614_v54  ;;  %v774_v12 = vsel %vm773_vm3, 0.0, %v1614_v54  ;;  %v747_v13 = vmul.f32 0.5, %v1973_v53  ;;  %s1523_s25 = scalar_lea.vmem %s2312_s10, 1024  ;;  %s1527_s12 = sshll.u32 %s1615_s29, 4  ;;  %s1528_s12 = int_to_ptr.vmem [resolvable:$false] %s1527_s12 }
 0x103   : > { %1178 = vst.msk [vmem:[%s2287_s27 + $0x20] sm:$0xff] %vm322_vm0, %v780_v9  ;;  %v783_v62 = vadd.f32 %v2195_v20, %v717_v57  ;;  %v719_v14 = vmul.f32 0.3, %v717_v57  ;;  %v745_v8 = vmul.f32 0.3, %v743_v11  ;;  %v765_v15 = vadd.f32 %v743_v11, %v2191_v17  ;;  %1177 = vst.msk [vmem:[%s2287_s27 + $0x18] sm:$0xff] %vm322_vm0, %v774_v12  ;;  %p1524_p10 = scmp.ne.s32.totalorder %s2312_s10, %s1523_s25  ;;  %p1530_p11 = scmp.lt.s32.totalorder %s2312_s10, %s1528_s12 }
 0x104   : > { %v723_v27 = vmul.f32 0.2, %v717_v57  ;;  %v749_v29 = vmul.f32 0.2, %v743_v11  ;;  %s1529_s22 = scalar_lea.vmem %s1528_s12, 2048 }
 0x105   : > { %v784_v2 = vmul.f32 0.5, %v783_v62  ;;  %v720_v18 = vadd.f32 %v719_v14, %v718_v7  ;;  %v746_v21 = vadd.f32 %v745_v8, %v744_v49  ;;  %v766_v24 = vmul.f32 0.5, %v765_v15  ;;  %p1525_p1 = pnand %p1524_p10, %p2396_p8  ;;  %p1531_p0 = scmp.lt.s32.totalorder %s1529_s22, %s1523_s25 }
 0x107   : > { %vm785_vm4 = vcmp.lt.f32.partialorder %v784_v2, 0.12  ;;  %v722_v25 = vadd.f32 %v721_v60, %v720_v18  ;;  %v748_v20 = vadd.f32 %v747_v13, %v746_v21  ;;  %vm767_vm5 = vcmp.lt.f32.partialorder %v766_v24, 0.12  ;;  %p1526_p4 = pneg %p1525_p1  ;;  %p1532_p6 = por %p1531_p0, %p1530_p11 }
 0x108   : > { %v786_v30 = vsel %vm785_vm4, 0.0, %v1614_v54  ;;  %v768_v31 = vsel %vm767_vm5, 0.0, %v1614_v54 }
 0x109   : > { %1179 = vst.msk [vmem:[%s2287_s27 + $0x28] sm:$0xff] %vm322_vm0, %v786_v30  ;;  %v724_v42 = vmul.f32 0.3, %v722_v25  ;;  %v789_v17 = vadd.f32 %v2130_v48, %v722_v25  ;;  %v750_v37 = vmul.f32 0.3, %v748_v20  ;;  %v759_v34 = vadd.f32 %v1973_v53, %v748_v20  ;;  %1176 = vst.msk [vmem:[%s2287_s27 + $0x10] sm:$0xff] %vm322_vm0, %v768_v31  ;;  %p1533_p12 = pnand %p1532_p6, %p1526_p4 }
 0x10b   : > { %v790_v35 = vmul.f32 0.5, %v789_v17  ;;  %v725_v3 = vadd.f32 %v724_v42, %v723_v27  ;;  %v751_v10 = vadd.f32 %v750_v37, %v749_v29  ;;  %v760_v23 = vmul.f32 0.5, %v759_v34 }
 0x10d   : > { %vm791_vm6 = vcmp.lt.f32.partialorder %v790_v35, 0.12  ;;  %v727_v19 = vadd.f32 %v726_v32, %v725_v3  ;;  %v753_v48 = vadd.f32 %v752_v33, %v751_v10  ;;  %vm761_vm7 = vcmp.lt.f32.partialorder %v760_v23, 0.12 }
 0x10e   : > { %v792_v38 = vsel %vm791_vm6, 0.0, %v1614_v54  ;;  %v762_v39 = vsel %vm761_vm7, 0.0, %v1614_v54 }
 0x10f   : > { %1180 = vst.msk [vmem:[%s2287_s27 + $0x30] sm:$0xff] %vm322_vm0, %v792_v38  ;;  %v795_v53 = vadd.f32 %v2164_v22, %v727_v19  ;;  %v754_v43 = vadd.f32 %v1955_v28, %v753_v48  ;;  %1175 = vst.msk [vmem:[%s2287_s27 + $0x8] sm:$0xff] %vm322_vm0, %v762_v39 }
 0x111   : > { %v796_v47 = vmul.f32 0.5, %v795_v53  ;;  %v755_v51 = vmul.f32 0.5, %v754_v43 }
 0x113   : > { %vm797_vm8 = vcmp.lt.f32.partialorder %v796_v47, 0.12  ;;  %vm756_vm9 = vcmp.lt.f32.partialorder %v755_v51, 0.12 }
 0x114   : > { %v798_v55 = vsel %vm797_vm8, 0.0, %v1614_v54  ;;  %v757_v28 = vsel %vm756_vm9, 0.0, %v1614_v54 }
 0x115   : > { %1181 = vst.msk [vmem:[%s2287_s27 + $0x38] sm:$0xff] %vm322_vm0, %v798_v55  ;;  %758 = vst.msk [vmem:[%s2287_s27] sm:$0xff] %vm322_vm0, %v757_v28 }
 0x116   : > { %1536 = shalt.err (!%p1533_p12)
}
 0x117   : > { %s1537_s13 = scalar_lea.hbm %s2319_s15, 1024  ;;  %s1541_s9 = scalar_lea.hbm %s2372_s3, 2048 }
 0x118   : > { %p1538_p7 = scmp.ne.s32.totalorder %s2319_s15, %s1537_s13  ;;  %p1542_p3 = scmp.lt.s32.totalorder %s2319_s15, %s2372_s3 }
 0x119   : > { %p1543_p13 = scmp.lt.s32.totalorder %s1541_s9, %s1537_s13 }
 0x11a   : > { %p1539_p5 = pnand %p1538_p7, %p2396_p8 }
 0x11b   : > { %p1544_p9 = por %p1543_p13, %p1542_p3 }
 0x11c   : > { %p1540_p2 = pneg %p1539_p5 }
 0x11e   : > { %p1545_p10 = pnand %p1544_p9, %p1540_p2 }
 0x120   : > { %1548 = shalt.err (!%p1545_p10)
}
 0x121   : > { %1198 = dma.vmem_to_hbm [thread:$0]  (%p2396_p8), %s2312_s10, 1024, %s2319_s15, %s882_s16, %s1609_s23, %s1612_s0, %s1613_s8  }
 0x122 PF: > { %s949_s28 = sand.u32 1, %s1587_s18   ;;  %p2397_p1 = scmp.ne.s32.totalorder %s2387_s6, 0 }
 0x123   : > { %p2398_p4 = scmp.ge.s32.totalorder %s1599_s21, 2  ;;  %s950_s26 = scalar_lea.sflag [#allocation4], %s949_s28 }
 0x125   : > { %p1216_p11 = pnand %p2398_p4, %p2397_p1 }
 0x127   : > { %p1217_p0 = pneg %p1216_p11 }
 0x129   : > { %1578 = dma.done.wait (%p1217_p0), %s950_s26, 1024  }
 0x12a   : > { %1580 = vsyncadd (%p1217_p0), %s950_s26, 4294966272  ;;  %s2399_s30 = sadd.s32 4294967294, %s1599_s21  }
 0x12b   : > { %s958_s27 = sand.u32 1, %s2399_s30  }
 0x12c   : > { %s959_s1 = scalar_lea.sflag [#allocation11], %s958_s27 }
 0x12d   : > { %1582 = dma.done.wait (%p1217_p0), %s959_s1, 3584  }
 0x12e   : > { %1584 = vsyncadd (%p1217_p0), %s959_s1, 4294963712  ;;  %s2400_s23 = sld [smem:[#allocation18_spill]]  ;;  %p26_p8 = scmp.ge.s32.totalorder %s1671_s24, 4  }
 0x12f   : > { %s2401_s20 = sld [smem:[#allocation19_spill]]  ;;  %s2402_s18 = smov %s1591_s19 }
 0x130   : > { %s2404_s21 = smov %s1671_s24  ;;  %28 = sbr.rel (!%p26_p8) target bundleno = 13 (0xd), region = 156 }
 0x134   : > { %s2403_s19 = smov %s2400_s23 }
 0x135   :  { %973 = vsyncpa [#allocation3], 1 }
 0x136   :  { %975 = vsyncpa [#allocation3 + $0x1], 1 }
 0x137   :  { %976 = vsyncpa [#allocation8], 1 }
 0x138   :  { %978 = vsyncpa [#allocation8 + $0x1], 1 }
 0x139   :  { %979 = vsyncpa [#allocation4], 1 }
 0x13a   :  { %981 = vsyncpa [#allocation4 + $0x1], 1 }
 0x13b   :  { %982 = vsyncpa [#allocation11], 1 }
 0x13c   :  { %984 = vsyncpa [#allocation11 + $0x1], 1 }
 0x13d   :  { %985 = vsyncpa [#allocation5], 1 }
 0x13e   :  { %987 = vsyncpa [#allocation5 + $0x1], 1 }

</bundles_post_ra>
